<compile_context>
chip_gen: v5e
topology: v5e:2x2
jax: 0.10.0
libtpu: 0.0.40
codegen_flags: <defaults>
</compile_context>

<pallas_src>
import functools

import jax
import jax.numpy as jnp
from jax.experimental import pallas as pl
from jax.experimental.pallas import tpu as pltpu


def _round_up(x, m):
    return ((x + m - 1) // m) * m


def _conv_bn_relu_kernel(x_ref, w_ref, b_ref, o_ref, patch_ref, *,
                         taps, oh, ow, cin_pad, k_true, stride, dilation):
    """Implicit-GEMM conv + folded BN + ReLU for one (image, Cout-tile).

    x_ref:     (1, H_pad, W_pad, Cin_pad)   padded NHWC image (VMEM resident)
    w_ref:     (K_pad, TN)                  BN-scale-folded fused-K weights
    b_ref:     (1, TN)                      folded BN (+conv) bias, f32
    o_ref:     (1, TN, OH*OW)               channel-major output tile
    patch_ref: (OH*OW, K_pad)               im2col patch scratch (persistent)
    """
    m = oh * ow
    k_pad = patch_ref.shape[1]

    # The patch depends only on the batch index: rebuild it only on the first
    # Cout tile of each image.  The Cout-tile grid axis is "arbitrary"
    # (sequential per core), so j == 0 always precedes j > 0 for a given n.
    @pl.when(pl.program_id(1) == 0)
    def _():
        x = x_ref[0]                                  # (H_pad, W_pad, Cin_pad)
        for t, (ki, kj) in enumerate(taps):
            r0 = ki * dilation
            c0 = kj * dilation
            xs = x[r0:r0 + (oh - 1) * stride + 1:stride,
                   c0:c0 + (ow - 1) * stride + 1:stride, :]   # (OH, OW, Cin_pad)
            patch_ref[:, t * cin_pad:(t + 1) * cin_pad] = xs.reshape(m, cin_pad)
        if k_pad > k_true:
            # Zero the lane-padding columns (weights there are zero too, but
            # uninitialized scratch could hold NaNs and NaN * 0 = NaN).
            patch_ref[:, k_true:] = jnp.zeros((m, k_pad - k_true),
                                              patch_ref.dtype)

    # One fused-K MXU matmul (K = KH*KW*Cin_pad, lane-dense) with f32 accum.
    acc = jnp.dot(patch_ref[...], w_ref[...],
                  preferred_element_type=jnp.float32)         # (M, TN) f32
    y = jnp.maximum(acc + b_ref[...], 0.0)                    # folded BN + ReLU
    # Single XLU transpose so the HBM output is already channel-major and
    # lane-dense along OH*OW; cast to the final dtype only at the store.
    o_ref[0] = y.T.astype(o_ref.dtype)


def conv_bn_relu(x, w, gamma, beta, running_mean, running_var, *,
                 conv_bias=None, stride=1, padding=0, dilation=1, eps=1e-5,
                 compute_dtype=jnp.float32, tn=None):
    """x: (N, Cin, H, W), w: (Cout, Cin, KH, KW).  Returns (N, Cout, OH, OW)."""
    N, Cin, H, W = x.shape
    Cout, _, KH, KW = w.shape
    OH = (H + 2 * padding - dilation * (KH - 1) - 1) // stride + 1
    OW = (W + 2 * padding - dilation * (KW - 1) - 1) // stride + 1
    H_pad, W_pad = H + 2 * padding, W + 2 * padding
    M = OH * OW

    # Output-channel tile: 256 drives the full v6e/v7x MXU width when there
    # are enough channels; 128 keeps small layers to one lane-dense tile.
    if tn is None:
        tn = 256 if Cout > 128 else 128

    # Contraction-channel padding follows the dtype sublane packing
    # (8 for f32, 16 for bf16, 32 for int8/fp8).
    pack = max(8, 32 // jnp.dtype(compute_dtype).itemsize)
    Cin_pad = _round_up(Cin, pack)
    Cout_pad = _round_up(Cout, tn)
    K = KH * KW * Cin_pad
    K_pad = max(K, 128)            # lane-dense matmul LHS even for tiny Cin

    # NCHW -> NHWC, spatial zero pad, channel pad.  (No HBM im2col expansion.)
    x_nhwc = jnp.transpose(x, (0, 2, 3, 1))
    x_p = jnp.pad(x_nhwc, ((0, 0), (padding, padding), (padding, padding),
                           (0, Cin_pad - Cin))).astype(compute_dtype)

    # Fold eval-mode BN (and optional conv bias) into per-channel scale/bias;
    # fold the scale into the weights and lay them out as one fused-K slab
    # matching the in-kernel patch layout [tap-major, Cin minor].
    scale = gamma / jnp.sqrt(running_var + eps)
    shift = -running_mean if conv_bias is None else conv_bias - running_mean
    bias = beta + scale * shift
    w_s = w * scale[:, None, None, None]                  # (Cout, Cin, KH, KW)
    w_t = jnp.transpose(w_s, (2, 3, 1, 0))                # (KH, KW, Cin, Cout)
    w_t = jnp.pad(w_t, ((0, 0), (0, 0), (0, Cin_pad - Cin),
                        (0, Cout_pad - Cout)))
    w_fused = w_t.reshape(K, Cout_pad)
    w_fused = jnp.pad(w_fused, ((0, K_pad - K), (0, 0))).astype(compute_dtype)
    bias_p = jnp.pad(bias, (0, Cout_pad - Cout)).reshape(1, Cout_pad)
    bias_p = bias_p.astype(jnp.float32)

    taps = tuple((i, j) for i in range(KH) for j in range(KW))
    kernel = functools.partial(_conv_bn_relu_kernel, taps=taps, oh=OH, ow=OW,
                               cin_pad=Cin_pad, k_true=K, stride=stride,
                               dilation=dilation)

    out_dtype = x.dtype
    grid = (N, Cout_pad // tn)

    it = jnp.dtype(compute_dtype).itemsize
    cost = pl.CostEstimate(
        flops=2 * N * OH * OW * KH * KW * Cin * Cout,
        transcendentals=0,
        bytes_accessed=(x_p.size * it + N * w_fused.size * it + bias_p.size * 4
                        + N * Cout_pad * M * jnp.dtype(out_dtype).itemsize))

    out = pl.pallas_call(
        kernel,
        out_shape=jax.ShapeDtypeStruct((N, Cout_pad, M), out_dtype),
        grid_spec=pltpu.PrefetchScalarGridSpec(
            num_scalar_prefetch=0,
            grid=grid,
            in_specs=[
                # Full padded image per batch element; the block index is
                # constant along the inner Cout-tile axis => DMA'd once/image.
                pl.BlockSpec((1, H_pad, W_pad, Cin_pad),
                             lambda n, j: (n, 0, 0, 0)),
                # Fused-K weight slab for this Cout tile.
                pl.BlockSpec((K_pad, tn), lambda n, j: (0, j)),
                # Folded BN bias for this Cout tile.
                pl.BlockSpec((1, tn), lambda n, j: (0, j)),
            ],
            out_specs=pl.BlockSpec((1, tn, M), lambda n, j: (n, j, 0)),
            scratch_shapes=[pltpu.VMEM((M, K_pad), compute_dtype)],
        ),
        compiler_params=pltpu.CompilerParams(
            # Batch axis sharded across TensorCores; Cout-tile axis sequential
            # so the per-image im2col patch scratch is legally reused.
            dimension_semantics=("parallel", "arbitrary")),
        cost_estimate=cost,
    )(x_p, w_fused, bias_p)

    # Channel-major already: drop channel padding, free reshape to NCHW.
    return out[:, :Cout, :].reshape(N, Cout, OH, OW)


def _reference(x, w, gamma, beta, running_mean, running_var,
               *, stride, padding, dilation, eps=1e-5):
    y = jax.lax.conv_general_dilated(
        x, w,
        window_strides=(stride, stride),
        padding=[(padding, padding), (padding, padding)],
        rhs_dilation=(dilation, dilation),
        dimension_numbers=("NCHW", "OIHW", "NCHW"))
    scale = gamma / jnp.sqrt(running_var + eps)
    bias = beta - running_mean * scale
    y = y * scale[None, :, None, None] + bias[None, :, None, None]
    return jnp.maximum(y, 0.0)


if __name__ == "__main__":
    key = jax.random.PRNGKey(0)
    k_x, k_w, k_g, k_b, k_m, k_v = jax.random.split(key, 6)

    # ConvBnRelu(in_channels=4, out_channels=8, kernel_size=3, stride=1, padding=1)
    N, Cin, H, W = 2, 4, 16, 16
    Cout, KH, KW = 8, 3, 3
    stride, padding, dilation = 1, 1, 1

    x = jax.random.normal(k_x, (N, Cin, H, W), dtype=jnp.float32)
    w = jax.random.normal(k_w, (Cout, Cin, KH, KW), dtype=jnp.float32) * 0.1
    gamma = 1.0 + 0.1 * jax.random.normal(k_g, (Cout,), dtype=jnp.float32)
    beta = 0.1 * jax.random.normal(k_b, (Cout,), dtype=jnp.float32)
    running_mean = 0.05 * jax.random.normal(k_m, (Cout,), dtype=jnp.float32)
    running_var = 1.0 + 0.1 * jax.nn.softplus(
        jax.random.normal(k_v, (Cout,), dtype=jnp.float32))

    ref = _reference(x, w, gamma, beta, running_mean, running_var,
                     stride=stride, padding=padding, dilation=dilation)
    ref = jax.block_until_ready(ref)

    # f32 MXU inputs: tight check against the XLA reference conv.
    out = conv_bn_relu(x, w, gamma, beta, running_mean, running_var,
                       stride=stride, padding=padding, dilation=dilation,
                       compute_dtype=jnp.float32)
    out = jax.block_until_ready(out)
    assert out.shape == (N, Cout, H, W), out.shape
    assert jnp.allclose(out, ref, atol=1e-4, rtol=1e-4), (
        float(jnp.max(jnp.abs(out - ref))))

    # bf16 MXU inputs with f32 accumulation; looser tolerance (bf16 rounding
    # of the BN-folded weights/activations).
    out_bf16 = conv_bn_relu(x, w, gamma, beta, running_mean, running_var,
                            stride=stride, padding=padding, dilation=dilation,
                            compute_dtype=jnp.bfloat16)
    out_bf16 = jax.block_until_ready(out_bf16)
    assert out_bf16.shape == (N, Cout, H, W), out_bf16.shape
    assert jnp.allclose(out_bf16, ref, atol=1e-1, rtol=1e-1), (
        float(jnp.max(jnp.abs(out_bf16 - ref))))

    print("KERNEL_OK")
</pallas_src>

<mosaic_0001>
module attributes {stable_mosaic.version = 11 : i64} {
  func.func @_conv_bn_relu_kernel(%arg0: i32, %arg1: i32, %arg2: memref<1x18x18x8xf32, #tpu.memory_space<vmem>>, %arg3: memref<128x128xf32, #tpu.memory_space<vmem>>, %arg4: memref<1x128xf32, #tpu.memory_space<vmem>>, %arg5: memref<1x128x256xf32, #tpu.memory_space<vmem>>, %arg6: memref<256x128xf32, #tpu.memory_space<vmem>>) attributes {dimension_semantics = [#tpu.dimension_semantics<parallel>, #tpu.dimension_semantics<arbitrary>], iteration_bounds = array<i64: 2, 1>, scalar_prefetch = 0 : i64, scratch_operands = 1 : i64, tpu.core_type = #tpu.core_type<tc>, window_params = [{transform_indices = @transform_0, window_bounds = array<i64: 1, 18, 18, 8>}, {transform_indices = @transform_1, window_bounds = array<i64: 128, 128>}, {transform_indices = @transform_2, window_bounds = array<i64: 1, 128>}, {transform_indices = @transform_3, window_bounds = array<i64: 1, 128, 256>}]} {
    %c0_i32 = arith.constant 0 : i32
    %0 = arith.cmpi eq, %arg1, %c0_i32 : i32
    %1 = arith.extui %0 : i1 to i32
    %c0_i32_0 = arith.constant 0 : i32
    %2 = arith.cmpi ne, %1, %c0_i32_0 : i32
    scf.if %2 {
      %c0_10 = arith.constant 0 : index
      %c0_11 = arith.constant 0 : index
      %c0_12 = arith.constant 0 : index
      %c0_13 = arith.constant 0 : index
      %15 = vector.load %arg2[%c0_10, %c0_11, %c0_12, %c0_13] : memref<1x18x18x8xf32, #tpu.memory_space<vmem>>, vector<1x18x18x8xf32>
      %16 = vector.shape_cast %15 : vector<1x18x18x8xf32> to vector<18x18x8xf32>
      %17 = vector.extract_strided_slice %16 {offsets = [0, 0, 0], sizes = [16, 16, 8], strides = [1, 1, 1]} : vector<18x18x8xf32> to vector<16x16x8xf32>
      %18 = vector.shape_cast %17 : vector<16x16x8xf32> to vector<256x8xf32>
      %c0_14 = arith.constant 0 : index
      %c0_15 = arith.constant 0 : index
      %19 = vector.load %arg6[%c0_14, %c0_15] : memref<256x128xf32, #tpu.memory_space<vmem>>, vector<256x8xf32>
      tpu.vector_store %arg6[%c0_14, %c0_15], %18 {strides = array<i32>} : memref<256x128xf32, #tpu.memory_space<vmem>>, vector<256x8xf32>,
      %20 = vector.extract_strided_slice %16 {offsets = [0, 1, 0], sizes = [16, 16, 8], strides = [1, 1, 1]} : vector<18x18x8xf32> to vector<16x16x8xf32>
      %21 = vector.shape_cast %20 : vector<16x16x8xf32> to vector<256x8xf32>
      %c0_16 = arith.constant 0 : index
      %c8 = arith.constant 8 : index
      %22 = vector.load %arg6[%c0_16, %c8] : memref<256x128xf32, #tpu.memory_space<vmem>>, vector<256x8xf32>
      tpu.vector_store %arg6[%c0_16, %c8], %21 {strides = array<i32>} : memref<256x128xf32, #tpu.memory_space<vmem>>, vector<256x8xf32>,
      %23 = vector.extract_strided_slice %16 {offsets = [0, 2, 0], sizes = [16, 16, 8], strides = [1, 1, 1]} : vector<18x18x8xf32> to vector<16x16x8xf32>
      %24 = vector.shape_cast %23 : vector<16x16x8xf32> to vector<256x8xf32>
      %c0_17 = arith.constant 0 : index
      %c16 = arith.constant 16 : index
      %25 = vector.load %arg6[%c0_17, %c16] : memref<256x128xf32, #tpu.memory_space<vmem>>, vector<256x8xf32>
      tpu.vector_store %arg6[%c0_17, %c16], %24 {strides = array<i32>} : memref<256x128xf32, #tpu.memory_space<vmem>>, vector<256x8xf32>,
      %26 = vector.extract_strided_slice %16 {offsets = [1, 0, 0], sizes = [16, 16, 8], strides = [1, 1, 1]} : vector<18x18x8xf32> to vector<16x16x8xf32>
      %27 = vector.shape_cast %26 : vector<16x16x8xf32> to vector<256x8xf32>
      %c0_18 = arith.constant 0 : index
      %c24 = arith.constant 24 : index
      %28 = vector.load %arg6[%c0_18, %c24] : memref<256x128xf32, #tpu.memory_space<vmem>>, vector<256x8xf32>
      tpu.vector_store %arg6[%c0_18, %c24], %27 {strides = array<i32>} : memref<256x128xf32, #tpu.memory_space<vmem>>, vector<256x8xf32>,
      %29 = vector.extract_strided_slice %16 {offsets = [1, 1, 0], sizes = [16, 16, 8], strides = [1, 1, 1]} : vector<18x18x8xf32> to vector<16x16x8xf32>
      %30 = vector.shape_cast %29 : vector<16x16x8xf32> to vector<256x8xf32>
      %c0_19 = arith.constant 0 : index
      %c32 = arith.constant 32 : index
      %31 = vector.load %arg6[%c0_19, %c32] : memref<256x128xf32, #tpu.memory_space<vmem>>, vector<256x8xf32>
      tpu.vector_store %arg6[%c0_19, %c32], %30 {strides = array<i32>} : memref<256x128xf32, #tpu.memory_space<vmem>>, vector<256x8xf32>,
      %32 = vector.extract_strided_slice %16 {offsets = [1, 2, 0], sizes = [16, 16, 8], strides = [1, 1, 1]} : vector<18x18x8xf32> to vector<16x16x8xf32>
      %33 = vector.shape_cast %32 : vector<16x16x8xf32> to vector<256x8xf32>
      %c0_20 = arith.constant 0 : index
      %c40 = arith.constant 40 : index
      %34 = vector.load %arg6[%c0_20, %c40] : memref<256x128xf32, #tpu.memory_space<vmem>>, vector<256x8xf32>
      tpu.vector_store %arg6[%c0_20, %c40], %33 {strides = array<i32>} : memref<256x128xf32, #tpu.memory_space<vmem>>, vector<256x8xf32>,
      %35 = vector.extract_strided_slice %16 {offsets = [2, 0, 0], sizes = [16, 16, 8], strides = [1, 1, 1]} : vector<18x18x8xf32> to vector<16x16x8xf32>
      %36 = vector.shape_cast %35 : vector<16x16x8xf32> to vector<256x8xf32>
      %c0_21 = arith.constant 0 : index
      %c48 = arith.constant 48 : index
      %37 = vector.load %arg6[%c0_21, %c48] : memref<256x128xf32, #tpu.memory_space<vmem>>, vector<256x8xf32>
      tpu.vector_store %arg6[%c0_21, %c48], %36 {strides = array<i32>} : memref<256x128xf32, #tpu.memory_space<vmem>>, vector<256x8xf32>,
      %38 = vector.extract_strided_slice %16 {offsets = [2, 1, 0], sizes = [16, 16, 8], strides = [1, 1, 1]} : vector<18x18x8xf32> to vector<16x16x8xf32>
      %39 = vector.shape_cast %38 : vector<16x16x8xf32> to vector<256x8xf32>
      %c0_22 = arith.constant 0 : index
      %c56 = arith.constant 56 : index
      %40 = vector.load %arg6[%c0_22, %c56] : memref<256x128xf32, #tpu.memory_space<vmem>>, vector<256x8xf32>
      tpu.vector_store %arg6[%c0_22, %c56], %39 {strides = array<i32>} : memref<256x128xf32, #tpu.memory_space<vmem>>, vector<256x8xf32>,
      %41 = vector.extract_strided_slice %16 {offsets = [2, 2, 0], sizes = [16, 16, 8], strides = [1, 1, 1]} : vector<18x18x8xf32> to vector<16x16x8xf32>
      %42 = vector.shape_cast %41 : vector<16x16x8xf32> to vector<256x8xf32>
      %c0_23 = arith.constant 0 : index
      %c64 = arith.constant 64 : index
      %43 = vector.load %arg6[%c0_23, %c64] : memref<256x128xf32, #tpu.memory_space<vmem>>, vector<256x8xf32>
      tpu.vector_store %arg6[%c0_23, %c64], %42 {strides = array<i32>} : memref<256x128xf32, #tpu.memory_space<vmem>>, vector<256x8xf32>,
      %cst_24 = arith.constant 0.000000e+00 : f32
      %44 = vector.broadcast %cst_24 : f32 to vector<256x56xf32>
      %c0_25 = arith.constant 0 : index
      %c72 = arith.constant 72 : index
      %45 = vector.load %arg6[%c0_25, %c72] : memref<256x128xf32, #tpu.memory_space<vmem>>, vector<256x56xf32>
      tpu.vector_store %arg6[%c0_25, %c72], %44 {strides = array<i32>} : memref<256x128xf32, #tpu.memory_space<vmem>>, vector<256x56xf32>,
    } else {
    }
    %c0 = arith.constant 0 : index
    %c0_1 = arith.constant 0 : index
    %3 = vector.load %arg6[%c0, %c0_1] : memref<256x128xf32, #tpu.memory_space<vmem>>, vector<256x128xf32>
    %c0_2 = arith.constant 0 : index
    %c0_3 = arith.constant 0 : index
    %4 = vector.load %arg3[%c0_2, %c0_3] : memref<128x128xf32, #tpu.memory_space<vmem>>, vector<128x128xf32>
    %cst = arith.constant dense<0.000000e+00> : vector<256x128xf32>
    %5 = tpu.matmul %3, %4, %cst {dimension_numbers = #tpu.dot_dimension_numbers<[1], [0], [0], [1], [0, 0, 1, 1], [], []>} : vector<256x128xf32>, vector<128x128xf32>, vector<256x128xf32> -> vector<256x128xf32>
    %c0_4 = arith.constant 0 : index
    %c0_5 = arith.constant 0 : index
    %6 = vector.load %arg4[%c0_4, %c0_5] : memref<1x128xf32, #tpu.memory_space<vmem>>, vector<1x128xf32>
    %7 = vector.broadcast %6 : vector<1x128xf32> to vector<256x128xf32>
    %8 = arith.addf %5, %7 : vector<256x128xf32>
    %cst_6 = arith.constant 0.000000e+00 : f32
    %9 = vector.broadcast %cst_6 : f32 to vector<256x128xf32>
    %10 = arith.maximumf %8, %9 : vector<256x128xf32>
    %11 = tpu.transpose %10, [1, 0] : vector<256x128xf32> -> vector<128x256xf32>
    %c0_7 = arith.constant 0 : index
    %c0_8 = arith.constant 0 : index
    %c0_9 = arith.constant 0 : index
    %12 = vector.load %arg5[%c0_7, %c0_8, %c0_9] : memref<1x128x256xf32, #tpu.memory_space<vmem>>, vector<1x128x256xf32>
    %13 = vector.shape_cast %12 : vector<1x128x256xf32> to vector<128x256xf32>
    %14 = vector.shape_cast %11 : vector<128x256xf32> to vector<1x128x256xf32>
    tpu.vector_store %arg5[%c0_7, %c0_8, %c0_9], %14 {strides = array<i32>} : memref<1x128x256xf32, #tpu.memory_space<vmem>>, vector<1x128x256xf32>,
    return
  }
  func.func @transform_0(%arg0: i32, %arg1: i32) -> (i32, i32, i32, i32) {
    %c0_i32 = arith.constant 0 : i32
    %c0_i32_0 = arith.constant 0 : i32
    %c0_i32_1 = arith.constant 0 : i32
    %c0_i32_2 = arith.constant 0 : i32
    return %arg0, %c0_i32, %c0_i32_0, %c0_i32_1 : i32, i32, i32, i32
  }
  func.func @transform_1(%arg0: i32, %arg1: i32) -> (i32, i32) {
    %c0_i32 = arith.constant 0 : i32
    %c0_i32_0 = arith.constant 0 : i32
    return %c0_i32, %arg1 : i32, i32
  }
  func.func @transform_2(%arg0: i32, %arg1: i32) -> (i32, i32) {
    %c0_i32 = arith.constant 0 : i32
    %c0_i32_0 = arith.constant 0 : i32
    return %c0_i32, %arg1 : i32, i32
  }
  func.func @transform_3(%arg0: i32, %arg1: i32) -> (i32, i32, i32) {
    %c0_i32 = arith.constant 0 : i32
    %c0_i32_0 = arith.constant 0 : i32
    return %arg0, %arg1, %c0_i32 : i32, i32, i32
  }
}

</mosaic_0001>

<bundles_post_ra>
// kernel: tpu_custom_call.1
= control target key start
LH: loop header
LB: loop body
LE: loop exit
PB: predicated region body
PF: predicated region fallthrough
CT: control target
= control target key end

     0   :  { %8 = vsyncpa [#allocation4], 0  ;;  %s3847_s0 = inlined_call_operand.vmem [shape: f32[2,18,18,8], index: 0, kind: input, shape index: {}]   ;;  %s3848_s1 = inlined_call_operand.vmem [shape: f32[128,128], index: 1, kind: input, shape index: {}]   ;;  %s3849_s2 = inlined_call_operand.vmem [shape: f32[1,128], index: 2, kind: input, shape index: {}]   ;;  %s3850_s3 = inlined_call_operand.hbm [shape: f32[2,128,256], index: 3, kind: output, shape index: {}]  }
   0x1   :  { %10 = vsyncpa [#allocation4 + $0x1], 0  ;;  %s2259_s12 = smov 0   ;;  %s2261_s13 = smov 0  }
   0x2   :  { %s2263_s14 = smov 0   ;;  %s2265_s15 = smov 0  }
   0x3   :  { %s2267_s16 = smov 0   ;;  %s2269_s17 = smov 0  }
   0x4 LB: > { %s2019_s18 = sadd.s32 4294967295, %s2227_s17   ;;  %s2020_s19 = sadd.s32 4294967294, %s2227_s17   ;;  %s2227_s17 = sphi %s2269_s17, %s16_s17   ;;  %s2223_s16 = sphi %s2267_s16, %s4052_s16   ;;  %s2219_s15 = sphi %s2265_s15, %s4051_s15   ;;  %s2215_s14 = sphi %s2263_s14, %s4050_s14   ;;  %s2211_s13 = sphi %s2261_s13, %s4049_s13   ;;  %s2207_s12 = sphi %s2259_s12, %s4048_s12  }
   0x5   : > { %s28_s20 = sadd.s32 1, %s2223_s16  ;;  %s115_s21 = sadd.s32 1, %s2215_s14 }
   0x6   : > { %p30_p0 = scmp.ge.s32.totalorder %s28_s20, 2  ;;  %p125_p1 = scmp.ne.s32.totalorder %s2215_s14, %s2211_s13 }
   0x7   : > { %p126_p2 = scmp.eq.s32.totalorder %s2019_s18, 1  ;;  %p131_p3 = scmp.ne.s32.totalorder %s2211_s13, %s2207_s12 }
   0x8   : > { %s4054_s20 = smov (%p30_p0, %s28_s20), 0  ;;  %p132_p5 = scmp.eq.s32.totalorder %s2020_s19, 1 }
   0x9   : > { %p2299_p4 = por %p126_p2, %p125_p1  ;;  %s110_s23 = ssub.s32 %s2223_s16, %s4054_s20 }
   0xa   : > { %p2025_p6 = scmp.ge.s32.totalorder %s2227_s17, 1  ;;  %p113_p7 = scmp.eq.s32.totalorder %s110_s23, 0 }
   0xb   : > { %p2306_p8 = por %p132_p5, %p131_p3  ;;  %p171_p9 = scmp.lt.s32.totalorder %s2227_s17, 3 }
   0xc   : > { %s2312_s25 = scalar_select %p113_p7, %s2215_s14, %s115_s21  }
   0xd   : > { %p172_p10 = pnand %p2025_p6, %p171_p9 }
   0xf   : > { %175 = sbr.rel (%p172_p10) target bundleno = 1158 (0x486), region = 32 }
  0x14   : > { %p202_p11 = scmp.lt.s32.totalorder %s2219_s15, 1  ;;  %vm354_vm0 = vcmask 1046528   ;;  %s2229_s4 = smov 8   ;;  %vm273_vm1 = vcmask 64512   ;;  %vm564_vm2 = vcmask 1045504   ;;  %vm531_vm3 = vcmask 130112  }
  0x15   : > { %s2230_s5 = smov 16   ;;  %s2231_s6 = smov 24   ;;  %vm741_vm4 = vcmask 195712   ;;  %vm872_vm5 = vcmask 261312   ;;  %vm1007_vm6 = vcmask 326912   ;;  %vm1141_vm7 = vcmask 392512  }
  0x16   : > { %s203_s26 = scalar_select %p202_p11, %s2219_s15, 1  ;;  %vm1272_vm8 = vcmask 458112   ;;  %vm1407_vm9 = vcmask 523712   ;;  %vm1541_vm10 = vcmask 589312   ;;  %vm1574_vm11 = vcmask 1048128  }
  0x17   : > { %s2232_s7 = smov 32   ;;  %s2233_s8 = smov 40  }
  0x18   : > { %s2082_s27 = smul.u32 432, %s203_s26  ;;  %s2234_s9 = smov 48  }
  0x19   : > { %s2235_s10 = smov 56   ;;  %s2236_s11 = smov 64  }
  0x1a   : > { %s2319_s30 = scalar_lea.vmem %s3847_s0, %s2082_s27  ;;  %s199_s28 = sand.u32 1, %s2211_s13  }
  0x1b   : > { %v2322_v0 = vld [vmem:[%s2319_s30] sm:$0xff]  ;;  %v2325_v1 = vld [vmem:[%s2319_s30 + $0x8] sm:$0xff]  ;;  %v2328_v2 = vld [vmem:[%s2319_s30 + $0x18] sm:$0xff]  ;;  %s2026_s29 = sshll.u32 %s199_s28, 8  ;;  %s1901_s19 = scalar_lea.sflag [#allocation4], %s199_s28 }
  0x1c   : > { %v355_v3 = vrot.slane %v2322_v0, 1  ;;  %v356_v4 = vrot.slane %v2325_v1, 1  ;;  %v2333_v5 = vld [vmem:[%s2319_s30 + $0x20] sm:$0xff]  ;;  %v360_v6 = vrot.slane %v2328_v2, 1  ;;  %v2338_v8 = vld [vmem:[%s2319_s30 + $0x10] sm:$0x3] }
  0x1d   : > { %v361_v7 = vrot.slane %v2333_v5, 1  ;;  %v2342_v10 = vld [vmem:[%s2319_s30 + $0x28] sm:$0x3]  ;;  %v2349_v12 = vld [vmem:[%s2319_s30 + $0x30] sm:$0xff]  ;;  %v2352_v13 = vld [vmem:[%s2319_s30 + $0x38] sm:$0xff]  ;;  %v358_v14 = vrot.slane %v2338_v8, 1 }
  0x1e   : > { %v357_v9 = vsel %vm354_vm0, %v355_v3, %v356_v4  ;;  %v365_v15 = vrot.slane %v2349_v12, 1  ;;  %v363_v16 = vrot.slane %v2342_v10, 1  ;;  %v366_v17 = vrot.slane %v2352_v13, 1  ;;  %v2361_v18 = vld [vmem:[%s2319_s30 + $0x40] sm:$0x3]  ;;  %v2373_v22 = vld [vmem:[%s2319_s30 + $0x48] sm:$0xff] }
  0x1f   : > { %435 = vrot.lane.b32.xlu0 %v357_v9, %s2229_s4  ;;  %v2346_v11 = vsel %vm354_vm0, %v360_v6, %v361_v7  ;;  %v359_v20 = vsel %vm354_vm0, %v356_v4, %v358_v14  ;;  %v2376_v23 = vld [vmem:[%s2319_s30 + $0x50] sm:$0xff]  ;;  %v368_v24 = vrot.slane %v2361_v18, 1  ;;  %v2380_v25 = vld [vmem:[%s2319_s30 + $0x58] sm:$0x3]  ;;  %v370_v26 = vrot.slane %v2373_v22, 1  ;;  %v2392_v30 = vld [vmem:[%s2319_s30 + $0x60] sm:$0xff] }
  0x20   : > { %439 = vrot.lane.b32.xlu1 %v2346_v11, %s2229_s4  ;;  %v2364_v19 = vsel %vm354_vm0, %v365_v15, %v366_v17  ;;  %v2370_v21 = vsel %vm354_vm0, %v361_v7, %v363_v16  ;;  %v371_v27 = vrot.slane %v2376_v23, 1  ;;  %v373_v28 = vrot.slane %v2380_v25, 1  ;;  %v2398_v32 = vld [vmem:[%s2319_s30 + $0x68] sm:$0xff]  ;;  %v2406_v34 = vld [vmem:[%s2319_s30 + $0x70] sm:$0x3]  ;;  %v2410_v36 = vld [vmem:[%s2319_s30 + $0x78] sm:$0xff] }
  0x21   : > { %443 = vrot.lane.b32.xlu2 %v2364_v19, %s2229_s4  ;;  %v2389_v29 = vsel %vm354_vm0, %v366_v17, %v368_v24  ;;  %v375_v35 = vrot.slane %v2392_v30, 1  ;;  %v2413_v37 = vld [vmem:[%s2319_s30 + $0x80] sm:$0xff]  ;;  %v376_v38 = vrot.slane %v2398_v32, 1  ;;  %v378_v39 = vrot.slane %v2406_v34, 1  ;;  %v2427_v43 = vld [vmem:[%s2319_s30 + $0x88] sm:$0x3] }
  0x22   : > { %v2395_v31 = vsel %vm354_vm0, %v370_v26, %v371_v27  ;;  %v2403_v33 = vsel %vm354_vm0, %v371_v27, %v373_v28  ;;  %v380_v40 = vrot.slane %v2410_v36, 1  ;;  %v381_v41 = vrot.slane %v2413_v37, 1  ;;  %v2438_v46 = vld [vmem:[%s2319_s30 + $0x90] sm:$0xff]  ;;  %v2441_v47 = vld [vmem:[%s2319_s30 + $0x98] sm:$0xff]  ;;  %v2445_v49 = vld [vmem:[%s2319_s30 + $0xa0] sm:$0x3] }
  0x23   : > { %v2424_v42 = vsel %vm354_vm0, %v375_v35, %v376_v38  ;;  %v2430_v44 = vsel %vm354_vm0, %v376_v38, %v378_v39  ;;  %v383_v48 = vrot.slane %v2427_v43, 1  ;;  %v385_v50 = vrot.slane %v2438_v46, 1  ;;  %v2458_v54 = vld [vmem:[%s2319_s30 + $0xa8] sm:$0xff]  ;;  %v2464_v56 = vld [vmem:[%s2319_s30 + $0xb0] sm:$0xff]  ;;  %v2472_v58 = vld [vmem:[%s2319_s30 + $0xb8] sm:$0x3] }
  0x24   : > { %3934 = vst [vmem:[#allocation6_spill] sm:$0xff] %v2424_v42  ;;  %v2435_v45 = vsel %vm354_vm0, %v380_v40, %v381_v41  ;;  %v386_v51 = vrot.slane %v2441_v47, 1  ;;  %v388_v52 = vrot.slane %v2445_v49, 1  ;;  %v390_v59 = vrot.slane %v2458_v54, 1  ;;  %v2476_v60 = vld [vmem:[%s2319_s30 + $0xc0] sm:$0xff]  ;;  %v2479_v61 = vld [vmem:[%s2319_s30 + $0xc8] sm:$0xff] }
  0x25   : > { %3935 = vst [vmem:[#allocation7_spill] sm:$0xff] %v2430_v44  ;;  %v2455_v53 = vsel %vm354_vm0, %v381_v41, %v383_v48  ;;  %v391_v62 = vrot.slane %v2464_v56, 1  ;;  %v393_v63 = vrot.slane %v2472_v58, 1  ;;  %v395_v3 = vrot.slane %v2476_v60, 1  ;;  %v2493_v7 = vld [vmem:[%s2319_s30 + $0xd0] sm:$0x3] }
  0x26   : > { %3936 = vst [vmem:[#allocation8_spill] sm:$0xff] %v2435_v45  ;;  %v2461_v55 = vsel %vm354_vm0, %v385_v50, %v386_v51  ;;  %v2469_v57 = vsel %vm354_vm0, %v386_v51, %v388_v52  ;;  %v396_v4 = vrot.slane %v2479_v61, 1  ;;  %v2504_v15 = vld [vmem:[%s2319_s30 + $0xd8] sm:$0xff]  ;;  %v2507_v16 = vld [vmem:[%s2319_s30 + $0xe0] sm:$0xff]  ;;  %v398_v17 = vrot.slane %v2493_v7, 1  ;;  %v2524_v35 = vld [vmem:[%s2319_s30 + $0xf0] sm:$0xff] }
  0x27   : > { %437 = vrot.lane.b32.xlu0 %v359_v20, %s2229_s4  ;;  %3937 = vst [vmem:[#allocation9_spill] sm:$0xff] %v2455_v53  ;;  %v2490_v6 = vsel %vm354_vm0, %v390_v59, %v391_v62  ;;  %v2496_v9 = vsel %vm354_vm0, %v391_v62, %v393_v63  ;;  %v2511_v20 = vld [vmem:[%s2319_s30 + $0xe8] sm:$0x3]  ;;  %v400_v24 = vrot.slane %v2504_v15, 1  ;;  %v401_v26 = vrot.slane %v2507_v16, 1  ;;  %v2530_v39 = vld [vmem:[%s2319_s30 + $0xf8] sm:$0xff] }
  0x28   : > { %441 = vrot.lane.b32.xlu1 %v2370_v21, %s2229_s4  ;;  %3938 = vst [vmem:[#allocation10_spill] sm:$0xff] %v2461_v55  ;;  %v2501_v14 = vsel %vm354_vm0, %v395_v3, %v396_v4  ;;  %v403_v27 = vrot.slane %v2511_v20, 1  ;;  %v2521_v28 = vsel %vm354_vm0, %v396_v4, %v398_v17  ;;  %v2538_v41 = vld [vmem:[%s2319_s30 + $0x100] sm:$0x3]  ;;  %v405_v48 = vrot.slane %v2524_v35, 1  ;;  %v2542_v50 = vld [vmem:[%s2319_s30 + $0x108] sm:$0xff] }
  0x29   : > { %445 = vrot.lane.b32.xlu2 %v2389_v29, %s2229_s4  ;;  %3939 = vst [vmem:[#allocation11_spill] sm:$0xff] %v2469_v57  ;;  %v2527_v38 = vsel %vm354_vm0, %v400_v24, %v401_v26  ;;  %v2545_v51 = vld [vmem:[%s2319_s30 + $0x110] sm:$0xff]  ;;  %v406_v52 = vrot.slane %v2530_v39, 1  ;;  %v408_v59 = vrot.slane %v2538_v41, 1  ;;  %v410_v62 = vrot.slane %v2542_v50, 1  ;;  %s2169_s27 = scalar_lea.hbm %s3850_s3, 512 }
  0x2a   : > { %3940 = vst [vmem:[#allocation12_spill] sm:$0xff] %v2490_v6  ;;  %v2535_v40 = vsel %vm354_vm0, %v401_v26, %v403_v27  ;;  %v411_v63 = vrot.slane %v2545_v51, 1  ;;  %v2559_v4 = vld [vmem:[%s2319_s30 + $0x118] sm:$0x3]  ;;  %v2570_v26 = vld [vmem:[%s2319_s30 + $0x120] sm:$0xff]  ;;  %v2573_v27 = vld [vmem:[%s2319_s30 + $0x128] sm:$0xff] }
  0x2b   : > { %3941 = vst [vmem:[#allocation13_spill] sm:$0xff] %v2496_v9  ;;  %v2556_v3 = vsel %vm354_vm0, %v405_v48, %v406_v52  ;;  %v2562_v17 = vsel %vm354_vm0, %v406_v52, %v408_v59  ;;  %v413_v48 = vrot.slane %v2559_v4, 1  ;;  %v415_v52 = vrot.slane %v2570_v26, 1 }
  0x2c   : > { %3942 = vst [vmem:[#allocation14_spill] sm:$0xff] %v2501_v14  ;;  %v2567_v24 = vsel %vm354_vm0, %v410_v62, %v411_v63  ;;  %v416_v59 = vrot.slane %v2573_v27, 1 }
  0x2d   : > { %3943 = vst [vmem:[#allocation15_spill] sm:$0xff] %v2521_v28 }
  0x2e   : > { %3944 = vst [vmem:[#allocation16_spill] sm:$0xff] %v2527_v38 }
  0x2f   : > { %447 = vrot.lane.b32.xlu0 %v2395_v31, %s2229_s4  ;;  %3945 = vst [vmem:[#allocation17_spill] sm:$0xff] %v2535_v40 }
  0x30   : > { %449 = vrot.lane.b32.xlu1 %v2403_v33, %s2229_s4  ;;  %3946 = vst [vmem:[#allocation18_spill] sm:$0xff] %v2556_v3 }
  0x31   : > { %451 = vrot.lane.b32.xlu2 %v2424_v42, %s2229_s4  ;;  %3947 = vst [vmem:[#allocation19_spill] sm:$0xff] %v2562_v17  ;;  %v566_v42 = vrot.slane %v2325_v1, 2 }
  0x32   : > { %3948 = vst [vmem:[#allocation20_spill] sm:$0xff] %v2567_v24 }
  0x33   : > { %274 = vst.msk [vmem:[#allocation2] sm:$0xff] %vm273_vm1, %v2322_v0 }
  0x34   : > { %275 = vst.msk [vmem:[#allocation2 + $0x8] sm:$0xff] %vm273_vm1, %v2325_v1  ;;  %v573_v1 = vrot.slane %v2342_v10, 2  ;;  %v578_v10 = vrot.slane %v2361_v18, 2 }
  0x35   : > { %276 = vst.msk [vmem:[#allocation2 + $0x10] sm:$0xff] %vm273_vm1, %v2328_v2 }
  0x36   : > { %277 = vst.msk [vmem:[#allocation2 + $0x18] sm:$0xff] %vm273_vm1, %v2333_v5 }
  0x37   : > { %453 = vrot.lane.b32.xlu0 %v2430_v44, %s2229_s4  ;;  %v2643_v44 = vld [vmem:[%s2319_s30 + $0x178] sm:$0x3]  ;;  %278 = vst.msk [vmem:[#allocation2 + $0x20] sm:$0xff] %vm273_vm1, %v2349_v12 }
  0x38   : > { %455 = vrot.lane.b32.xlu1 %v2435_v45, %s2229_s4  ;;  %279 = vst.msk [vmem:[#allocation2 + $0x28] sm:$0xff] %vm273_vm1, %v2352_v13 }
  0x39   : > { %457 = vrot.lane.b32.xlu2 %v2455_v53, %s2229_s4  ;;  %v2639_v53 = vld [vmem:[%s2319_s30 + $0x170] sm:$0xff]  ;;  %280 = vst.msk [vmem:[#allocation2 + $0x30] sm:$0xff] %vm273_vm1, %v2373_v22 }
  0x3a   : > { %3958 = vst [vmem:[#allocation30_spill] sm:$0xff] %v2639_v53 }
  0x3b   : > { %281 = vst.msk [vmem:[#allocation2 + $0x38] sm:$0xff] %vm273_vm1, %v2376_v23 }
  0x3c   : > { %282 = vst.msk [vmem:[#allocation2 + $0x40] sm:$0xff] %vm273_vm1, %v2392_v30 }
  0x3d   : > { %283 = vst.msk [vmem:[#allocation2 + $0x48] sm:$0xff] %vm273_vm1, %v2398_v32 }
  0x3e   : > { %284 = vst.msk [vmem:[#allocation2 + $0x50] sm:$0xff] %vm273_vm1, %v2410_v36 }
  0x3f   : > { %459 = vrot.lane.b32.xlu0 %v2461_v55, %s2229_s4  ;;  %285 = vst.msk [vmem:[#allocation2 + $0x58] sm:$0xff] %vm273_vm1, %v2413_v37 }
  0x40   : > { %461 = vrot.lane.b32.xlu1 %v2469_v57, %s2229_s4  ;;  %v2625_v57 = vld [vmem:[%s2319_s30 + $0x160] sm:$0x3]  ;;  %286 = vst.msk [vmem:[#allocation2 + $0x60] sm:$0xff] %vm273_vm1, %v2438_v46 }
  0x41   : > { %463 = vrot.lane.b32.xlu2 %v2490_v6, %s2229_s4  ;;  %v428_v45 = vrot.slane %v2625_v57, 1  ;;  %287 = vst.msk [vmem:[#allocation2 + $0x68] sm:$0xff] %vm273_vm1, %v2441_v47 }
  0x42   : > { %288 = vst.msk [vmem:[#allocation2 + $0x70] sm:$0xff] %vm273_vm1, %v2458_v54 }
  0x43   : > { %289 = vst.msk [vmem:[#allocation2 + $0x78] sm:$0xff] %vm273_vm1, %v2464_v56 }
  0x44   : > { %290 = vst.msk [vmem:[#allocation2 + $0x80] sm:$0xff] %vm273_vm1, %v2476_v60 }
  0x45   : > { %291 = vst.msk [vmem:[#allocation2 + $0x88] sm:$0xff] %vm273_vm1, %v2479_v61 }
  0x46   : > { %292 = vst.msk [vmem:[#allocation2 + $0x90] sm:$0xff] %vm273_vm1, %v2504_v15 }
  0x47   : > { %465 = vrot.lane.b32.xlu0 %v2496_v9, %s2229_s4  ;;  %v2611_v9 = vld [vmem:[%s2319_s30 + $0x158] sm:$0xff]  ;;  %293 = vst.msk [vmem:[#allocation2 + $0x98] sm:$0xff] %vm273_vm1, %v2507_v16 }
  0x48   : > { %467 = vrot.lane.b32.xlu1 %v2501_v14, %s2229_s4  ;;  %v2596_v14 = vld [vmem:[%s2319_s30 + $0x140] sm:$0xff]  ;;  %294 = vst.msk [vmem:[#allocation2 + $0xa0] sm:$0xff] %vm273_vm1, %v2524_v35 }
  0x49   : > { %469 = vrot.lane.b32.xlu2 %v2521_v28, %s2229_s4  ;;  %v2593_v28 = vsel %vm354_vm0, %v415_v52, %v416_v59  ;;  %3952 = vst [vmem:[#allocation24_spill] sm:$0xff] %v2596_v14  ;;  %v421_v52 = vrot.slane %v2596_v14, 1 }
  0x4a   : > { %3951 = vst [vmem:[#allocation23_spill] sm:$0xff] %v2593_v28 }
  0x4b   : > { %295 = vst.msk [vmem:[#allocation2 + $0xa8] sm:$0xff] %vm273_vm1, %v2530_v39 }
  0x4c   : > { %296 = vst.msk [vmem:[#allocation2 + $0xb0] sm:$0xff] %vm273_vm1, %v2542_v50 }
  0x4d   : > { %297 = vst.msk [vmem:[#allocation2 + $0xb8] sm:$0xff] %vm273_vm1, %v2545_v51 }
  0x4e   : > { %298 = vst.msk [vmem:[#allocation2 + $0xc0] sm:$0xff] %vm273_vm1, %v2570_v26 }
  0x4f   : > { %471 = vrot.lane.b32.xlu0 %v2527_v38, %s2229_s4  ;;  %v2590_v38 = vld [vmem:[%s2319_s30 + $0x138] sm:$0xff]  ;;  %299 = vst.msk [vmem:[#allocation2 + $0xc8] sm:$0xff] %vm273_vm1, %v2573_v27 }
  0x50   : > { %473 = vrot.lane.b32.xlu1 %v2535_v40, %s2229_s4  ;;  %v2577_v40 = vld [vmem:[%s2319_s30 + $0x130] sm:$0x3]  ;;  %3950 = vst [vmem:[#allocation22_spill] sm:$0xff] %v2590_v38 }
  0x51   : > { %475 = vrot.lane.b32.xlu2 %v2556_v3, %s2229_s4  ;;  %v418_v62 = vrot.slane %v2577_v40, 1  ;;  %v2587_v3 = vsel %vm354_vm0, %v411_v63, %v413_v48  ;;  %v420_v63 = vrot.slane %v2590_v38, 1  ;;  %v2608_v48 = vld [vmem:[%s2319_s30 + $0x150] sm:$0xff]  ;;  %300 = vst.msk [vmem:[#allocation2 + $0xd0] sm:$0xff] %vm273_vm1, %v2590_v38 }
  0x52   : > { %3949 = vst [vmem:[#allocation21_spill] sm:$0xff] %v2587_v3 }
  0x53   : > { %v2622_v6 = vsel %vm354_vm0, %v420_v63, %v421_v52  ;;  %301 = vst.msk [vmem:[#allocation2 + $0xd8] sm:$0xff] %vm273_vm1, %v2596_v14 }
  0x54   : > { %3954 = vst [vmem:[#allocation26_spill] sm:$0xff] %v2622_v6 }
  0x55   : > { %302 = vst.msk [vmem:[#allocation2 + $0xe0] sm:$0xff] %vm273_vm1, %v2608_v48 }
  0x56   : > { %303 = vst.msk [vmem:[#allocation2 + $0xe8] sm:$0xff] %vm273_vm1, %v2611_v9 }
  0x57   : > { %477 = vrot.lane.b32.xlu0 %v2562_v17, %s2229_s4  ;;  %v2604_v17 = vld [vmem:[%s2319_s30 + $0x148] sm:$0x3]  ;;  %305 = vst.msk [vmem:[#allocation2 + $0xf8] sm:$0xff] %vm273_vm1, %v2639_v53 }
  0x58   : > { %479 = vrot.lane.b32.xlu1 %v2567_v24, %s2229_s4  ;;  %v2601_v24 = vsel %vm354_vm0, %v416_v59, %v418_v62  ;;  %v423_v59 = vrot.slane %v2604_v17, 1  ;;  %v425_v62 = vrot.slane %v2608_v48, 1 }
  0x59   : > { %481 = vrot.lane.b32.xlu2 %v2587_v3, %s2229_s4  ;;  %3953 = vst [vmem:[#allocation25_spill] sm:$0xff] %v2601_v24  ;;  %v426_v3 = vrot.slane %v2611_v9, 1 }
  0x5a   : > { %v2628_v55 = vsel %vm354_vm0, %v421_v52, %v423_v59  ;;  %v431_v52 = vrot.slane %v2639_v53, 1  ;;  %v433_v59 = vrot.slane %v2643_v44, 1 }
  0x5b   : > { %3955 = vst [vmem:[#allocation27_spill] sm:$0xff] %v2628_v55 }
  0x5f   : > { %483 = vrot.lane.b32.xlu0 %v2593_v28, %s2229_s4  ;;  %v2633_v28 = vsel %vm354_vm0, %v425_v62, %v426_v3  ;;  %v2653_v62 = vsel %vm354_vm0, %v426_v3, %v428_v45  ;;  %v568_v45 = vrot.slane %v2338_v8, 2  ;;  %v570_v3 = vrot.slane %v2328_v2, 2 }
  0x60   : > { %485 = vrot.lane.b32.xlu1 %v2601_v24, %s2229_s4  ;;  %3956 = vst [vmem:[#allocation28_spill] sm:$0xff] %v2633_v28  ;;  %v2636_v24 = vld [vmem:[%s2319_s30 + $0x168] sm:$0xff] }
  0x61   : > { %487 = vrot.lane.b32.xlu2 %v2622_v6, %s2229_s4  ;;  %3957 = vst [vmem:[#allocation29_spill] sm:$0xff] %v2636_v24  ;;  %v430_v63 = vrot.slane %v2636_v24, 1  ;;  %v569_v8 = vsel %vm564_vm2, %v566_v42, %v568_v45 }
  0x62   : > { %304 = vst.msk [vmem:[#allocation2 + $0xf0] sm:$0xff] %vm273_vm1, %v2636_v24 }
  0x63   : > { %v2656_v6 = vsel %vm354_vm0, %v430_v63, %v431_v52  ;;  %v571_v63 = vrot.slane %v2333_v5, 2 }
  0x64   : > { %3959 = vst [vmem:[#allocation31_spill] sm:$0xff] %v2656_v6 }
  0x67   : > { %489 = vrot.lane.b32.xlu0 %v2628_v55, %s2229_s4  ;;  %v2661_v55 = vsel %vm354_vm0, %v431_v52, %v433_v59  ;;  %v2706_v59 = vsel %vm564_vm2, %v571_v63, %v573_v1  ;;  %v585_v1 = vrot.slane %v2392_v30, 2 }
  0x68   : > { %491 = vrot.lane.b32.xlu1 %v2633_v28, %s2229_s4  ;;  %3960 = vst [vmem:[#allocation32_spill] sm:$0xff] %v2661_v55  ;;  %v565_v28 = vrot.slane %v2322_v0, 2  ;;  %v2686_v0 = vsel %vm564_vm2, %v570_v3, %v571_v63  ;;  %v580_v3 = vrot.slane %v2373_v22, 2 }
  0x69   : > { %493 = vrot.lane.b32.xlu2 %v2653_v62, %s2229_s4 }
  0x6a   : > { %v567_v52 = vsel %vm564_vm2, %v565_v28, %v566_v42  ;;  %v575_v42 = vrot.slane %v2349_v12, 2  ;;  %v576_v28 = vrot.slane %v2352_v13, 2 }
  0x6c   : > { %v2713_v45 = vsel %vm564_vm2, %v575_v42, %v576_v28  ;;  %v2720_v18 = vsel %vm564_vm2, %v576_v28, %v578_v10  ;;  %v586_v42 = vrot.slane %v2398_v32, 2 }
  0x6d   : > { %3961 = vst [vmem:[#allocation33_spill] sm:$0xff] %v2720_v18 }
  0x6e   : > { %v2756_v10 = vsel %vm564_vm2, %v585_v1, %v586_v42 }
  0x6f   : > { %495 = vrot.lane.b32.xlu0 %v2656_v6, %s2229_s4  ;;  %3964 = vst [vmem:[#allocation36_spill] sm:$0xff] %v2756_v10 }
  0x70   : > { %497 = vrot.lane.b32.xlu1 %v2661_v55, %s2229_s4  ;;  %s3773_s4 = scalar_lea.vmem [#allocation3], %s2026_s29 }
  0x71   : > { %645 = vrot.lane.b32.xlu2 %v567_v52, %s2230_s5  ;;  %v581_v52 = vrot.slane %v2376_v23, 2  ;;  %s1916_s18 = sshll.u32 %s3773_s4, 4  ;;  %s1917_s18 = int_to_ptr.vmem [resolvable:$true] %s1916_s18 }
  0x73   : > { %v2742_v28 = vsel %vm564_vm2, %v580_v3, %v581_v52  ;;  %v588_v3 = vrot.slane %v2406_v34, 2  ;;  %v593_v34 = vrot.slane %v2427_v43, 2 }
  0x74   : > { %3962 = vst [vmem:[#allocation34_spill] sm:$0xff] %v2742_v28 }
  0x75   : > { %v2777_v1 = vsel %vm564_vm2, %v586_v42, %v588_v3  ;;  %v595_v42 = vrot.slane %v2438_v46, 2 }
  0x76   : > { %3965 = vst [vmem:[#allocation37_spill] sm:$0xff] %v2777_v1 }
  0x77   : > { %647 = vrot.lane.b32.xlu0 %v569_v8, %s2230_s5  ;;  %v583_v8 = vrot.slane %v2380_v25, 2 }
  0x78   : > { %649 = vrot.lane.b32.xlu1 %v2686_v0, %s2230_s5 }
  0x79   : > { %651 = vrot.lane.b32.xlu2 %v2706_v59, %s2230_s5  ;;  %v2749_v25 = vsel %vm564_vm2, %v581_v52, %v583_v8  ;;  %v590_v52 = vrot.slane %v2410_v36, 2  ;;  %v591_v8 = vrot.slane %v2413_v37, 2 }
  0x7a   : > { %3963 = vst [vmem:[#allocation35_spill] sm:$0xff] %v2749_v25 }
  0x7b   : > { %v444_v63 = vpop.permute.xlu2 %443  ;;  %v2793_v43 = vsel %vm564_vm2, %v591_v8, %v593_v34 }
  0x7c   : > { %3967 = vst [vmem:[#allocation39_spill] sm:$0xff] %v2793_v43 }
  0x7d   : > { %536 = vst.msk [vmem:[#allocation2 + $0x20] sm:$0xff] %vm531_vm3, %v444_v63 }
  0x7f   : > { %653 = vrot.lane.b32.xlu0 %v2713_v45, %s2230_s5 }
  0x80   : > { %655 = vrot.lane.b32.xlu1 %v2720_v18, %s2230_s5 }
  0x81   : > { %657 = vrot.lane.b32.xlu2 %v2742_v28, %s2230_s5 }
  0x83   : > { %v446_v18 = vpop.permute.xlu2 %445 }
  0x84   : > { %537 = vst.msk [vmem:[#allocation2 + $0x28] sm:$0xff] %vm531_vm3, %v446_v18  ;;  %v603_v18 = vrot.slane %v2472_v58, 2 }
  0x87   : > { %659 = vrot.lane.b32.xlu0 %v2749_v25, %s2230_s5  ;;  %v601_v25 = vrot.slane %v2464_v56, 2 }
  0x88   : > { %661 = vrot.lane.b32.xlu1 %v2756_v10, %s2230_s5  ;;  %v2784_v10 = vsel %vm564_vm2, %v590_v52, %v591_v8  ;;  %v596_v52 = vrot.slane %v2441_v47, 2  ;;  %v598_v8 = vrot.slane %v2445_v49, 2 }
  0x89   : > { %3966 = vst [vmem:[#allocation38_spill] sm:$0xff] %v2784_v10  ;;  %663 = vrot.lane.b32.xlu2 %v2777_v1, %s2230_s5  ;;  %v600_v1 = vrot.slane %v2458_v54, 2 }
  0x8b   : > { %v452_v3 = vpop.permute.xlu2 %451  ;;  %v2822_v49 = vsel %vm564_vm2, %v600_v1, %v601_v25  ;;  %v2834_v1 = vsel %vm564_vm2, %v601_v25, %v603_v18  ;;  %v611_v25 = vrot.slane %v2507_v16, 2  ;;  %v613_v18 = vrot.slane %v2511_v20, 2 }
  0x8c   : > { %540 = vst.msk [vmem:[#allocation2 + $0x40] sm:$0xff] %vm531_vm3, %v452_v3 }
  0x8d   : > { %3968 = vst [vmem:[#allocation40_spill] sm:$0xff] %v2834_v1 }
  0x8f   : > { %665 = vrot.lane.b32.xlu0 %v2784_v10, %s2230_s5  ;;  %v2811_v10 = vsel %vm564_vm2, %v595_v42, %v596_v52  ;;  %v606_v42 = vrot.slane %v2479_v61, 2 }
  0x90   : > { %667 = vrot.lane.b32.xlu1 %v2793_v43, %s2230_s5  ;;  %v2816_v43 = vsel %vm564_vm2, %v596_v52, %v598_v8  ;;  %v608_v52 = vrot.slane %v2493_v7, 2 }
  0x91   : > { %v436_v34 = vpop.permute.xlu0 %435  ;;  %669 = vrot.lane.b32.xlu2 %v2811_v10, %s2230_s5 }
  0x92   : > { %532 = vst.msk [vmem:[#allocation2] sm:$0xff] %vm531_vm3, %v436_v34  ;;  %v440_v28 = vpop.permute.xlu1 %439  ;;  %v2844_v34 = vsel %vm564_vm2, %v606_v42, %v608_v52 }
  0x93   : > { %534 = vst.msk [vmem:[#allocation2 + $0x10] sm:$0xff] %vm531_vm3, %v440_v28  ;;  %v458_v63 = vpop.permute.xlu2 %457  ;;  %v605_v28 = vrot.slane %v2476_v60, 2 }
  0x94   : > { %543 = vst.msk [vmem:[#allocation2 + $0x58] sm:$0xff] %vm531_vm3, %v458_v63  ;;  %v610_v63 = vrot.slane %v2504_v15, 2 }
  0x95   : > { %v2839_v8 = vsel %vm564_vm2, %v605_v28, %v606_v42  ;;  %3970 = vst [vmem:[#allocation42_spill] sm:$0xff] %v2844_v34  ;;  %v616_v42 = vrot.slane %v2530_v39, 2 }
  0x96   : > { %3969 = vst [vmem:[#allocation41_spill] sm:$0xff] %v2839_v8  ;;  %v2857_v52 = vsel %vm564_vm2, %v610_v63, %v611_v25  ;;  %v620_v63 = vrot.slane %v2542_v50, 2 }
  0x97   : > { %671 = vrot.lane.b32.xlu0 %v2816_v43, %s2230_s5  ;;  %3971 = vst [vmem:[#allocation43_spill] sm:$0xff] %v2857_v52 }
  0x98   : > { %673 = vrot.lane.b32.xlu1 %v2822_v49, %s2230_s5 }
  0x99   : > { %v438_v3 = vpop.permute.xlu0 %437  ;;  %675 = vrot.lane.b32.xlu2 %v2834_v1, %s2230_s5 }
  0x9a   : > { %533 = vst.msk [vmem:[#allocation2 + $0x8] sm:$0xff] %vm531_vm3, %v438_v3  ;;  %v442_v58 = vpop.permute.xlu1 %441  ;;  %v615_v3 = vrot.slane %v2524_v35, 2 }
  0x9b   : > { %535 = vst.msk [vmem:[#allocation2 + $0x18] sm:$0xff] %vm531_vm3, %v442_v58  ;;  %v464_v7 = vpop.permute.xlu2 %463 }
  0x9c   : > { %546 = vst.msk [vmem:[#allocation2 + $0x70] sm:$0xff] %vm531_vm3, %v464_v7  ;;  %v2862_v7 = vsel %vm564_vm2, %v611_v25, %v613_v18  ;;  %v2867_v20 = vsel %vm564_vm2, %v615_v3, %v616_v42  ;;  %v621_v25 = vrot.slane %v2545_v51, 2 }
  0x9d   : > { %3972 = vst [vmem:[#allocation44_spill] sm:$0xff] %v2862_v7 }
  0x9e   : > { %3973 = vst [vmem:[#allocation45_spill] sm:$0xff] %v2867_v20 }
  0x9f   : > { %677 = vrot.lane.b32.xlu0 %v2839_v8, %s2230_s5 }
  0xa0   : > { %679 = vrot.lane.b32.xlu1 %v2844_v34, %s2230_s5  ;;  %v618_v34 = vrot.slane %v2538_v41, 2 }
  0xa1   : > { %v448_v28 = vpop.permute.xlu0 %447  ;;  %681 = vrot.lane.b32.xlu2 %v2857_v52, %s2230_s5 }
  0xa2   : > { %538 = vst.msk [vmem:[#allocation2 + $0x30] sm:$0xff] %vm531_vm3, %v448_v28  ;;  %v450_v58 = vpop.permute.xlu1 %449  ;;  %v623_v28 = vrot.slane %v2559_v4, 2  ;;  %v2879_v3 = vsel %vm564_vm2, %v616_v42, %v618_v34  ;;  %v626_v34 = vrot.slane %v2573_v27, 2  ;;  %v628_v42 = vrot.slane %v2577_v40, 2 }
  0xa3   : > { %539 = vst.msk [vmem:[#allocation2 + $0x38] sm:$0xff] %vm531_vm3, %v450_v58  ;;  %v470_v8 = vpop.permute.xlu2 %469 }
  0xa4   : > { %549 = vst.msk [vmem:[#allocation2 + $0x88] sm:$0xff] %vm531_vm3, %v470_v8  ;;  %v2884_v8 = vsel %vm564_vm2, %v620_v63, %v621_v25  ;;  %v2889_v58 = vsel %vm564_vm2, %v621_v25, %v623_v28  ;;  %v631_v25 = vrot.slane %v2596_v14, 2 }
  0xa5   : > { %3974 = vst [vmem:[#allocation46_spill] sm:$0xff] %v2884_v8 }
  0xa6   : > { %3975 = vst [vmem:[#allocation47_spill] sm:$0xff] %v2889_v58 }
  0xa7   : > { %683 = vrot.lane.b32.xlu0 %v2862_v7, %s2230_s5 }
  0xa8   : > { %685 = vrot.lane.b32.xlu1 %v2867_v20, %s2230_s5  ;;  %v625_v20 = vrot.slane %v2570_v26, 2 }
  0xa9   : > { %v454_v18 = vpop.permute.xlu0 %453  ;;  %687 = vrot.lane.b32.xlu2 %v2879_v3, %s2230_s5 }
  0xaa   : > { %541 = vst.msk [vmem:[#allocation2 + $0x48] sm:$0xff] %vm531_vm3, %v454_v18  ;;  %v456_v41 = vpop.permute.xlu1 %455  ;;  %v630_v18 = vrot.slane %v2590_v38, 2  ;;  %v2902_v28 = vsel %vm564_vm2, %v625_v20, %v626_v34  ;;  %v635_v20 = vrot.slane %v2608_v48, 2 }
  0xab   : > { %542 = vst.msk [vmem:[#allocation2 + $0x50] sm:$0xff] %vm531_vm3, %v456_v41  ;;  %v476_v4 = vpop.permute.xlu2 %475 }
  0xac   : > { %552 = vst.msk [vmem:[#allocation2 + $0xa0] sm:$0xff] %vm531_vm3, %v476_v4  ;;  %v2907_v4 = vsel %vm564_vm2, %v626_v34, %v628_v42  ;;  %v2912_v40 = vsel %vm564_vm2, %v630_v18, %v631_v25  ;;  %v636_v34 = vrot.slane %v2611_v9, 2 }
  0xad   : > { %3976 = vst [vmem:[#allocation48_spill] sm:$0xff] %v2912_v40 }
  0xaf   : > { %689 = vrot.lane.b32.xlu0 %v2884_v8, %s2230_s5 }
  0xb0   : > { %691 = vrot.lane.b32.xlu1 %v2889_v58, %s2230_s5  ;;  %v633_v58 = vrot.slane %v2604_v17, 2 }
  0xb1   : > { %v460_v63 = vpop.permute.xlu0 %459  ;;  %693 = vrot.lane.b32.xlu2 %v2902_v28, %s2230_s5 }
  0xb2   : > { %544 = vst.msk [vmem:[#allocation2 + $0x60] sm:$0xff] %vm531_vm3, %v460_v63  ;;  %v462_v41 = vpop.permute.xlu1 %461  ;;  %v638_v63 = vrot.slane %v2625_v57, 2  ;;  %v2924_v18 = vsel %vm564_vm2, %v631_v25, %v633_v58  ;;  %v641_v58 = vrot.slane %v2639_v53, 2  ;;  %v643_v25 = vrot.slane %v2643_v44, 2 }
  0xb3   : > { %545 = vst.msk [vmem:[#allocation2 + $0x68] sm:$0xff] %vm531_vm3, %v462_v41  ;;  %v482_v8 = vpop.permute.xlu2 %481 }
  0xb4   : > { %555 = vst.msk [vmem:[#allocation2 + $0xb8] sm:$0xff] %vm531_vm3, %v482_v8  ;;  %v2929_v8 = vsel %vm564_vm2, %v635_v20, %v636_v34  ;;  %v2934_v41 = vsel %vm564_vm2, %v636_v34, %v638_v63  ;;  %v2950_v63 = vsel %vm564_vm2, %v641_v58, %v643_v25 }
  0xb5   : > { %3977 = vst [vmem:[#allocation49_spill] sm:$0xff] %v2924_v18 }
  0xb7   : > { %695 = vrot.lane.b32.xlu0 %v2907_v4, %s2230_s5 }
  0xb8   : > { %697 = vrot.lane.b32.xlu1 %v2912_v40, %s2230_s5  ;;  %v640_v40 = vrot.slane %v2636_v24, 2 }
  0xb9   : > { %v466_v42 = vpop.permute.xlu0 %465  ;;  %699 = vrot.lane.b32.xlu2 %v2924_v18, %s2230_s5 }
  0xba   : > { %547 = vst.msk [vmem:[#allocation2 + $0x78] sm:$0xff] %vm531_vm3, %v466_v42  ;;  %v468_v17 = vpop.permute.xlu1 %467  ;;  %v2945_v42 = vsel %vm564_vm2, %v640_v40, %v641_v58 }
  0xbb   : > { %548 = vst.msk [vmem:[#allocation2 + $0x80] sm:$0xff] %vm531_vm3, %v468_v17  ;;  %v488_v57 = vpop.permute.xlu2 %487 }
  0xbc   : > { %558 = vst.msk [vmem:[#allocation2 + $0xd0] sm:$0xff] %vm531_vm3, %v488_v57 }
  0xbf   : > { %701 = vrot.lane.b32.xlu0 %v2929_v8, %s2230_s5 }
  0xc0   : > { %703 = vrot.lane.b32.xlu1 %v2934_v41, %s2230_s5 }
  0xc1   : > { %v472_v20 = vpop.permute.xlu0 %471  ;;  %705 = vrot.lane.b32.xlu2 %v2945_v42, %s2230_s5 }
  0xc2   : > { %550 = vst.msk [vmem:[#allocation2 + $0x90] sm:$0xff] %vm531_vm3, %v472_v20  ;;  %v474_v34 = vpop.permute.xlu1 %473 }
  0xc3   : > { %551 = vst.msk [vmem:[#allocation2 + $0x98] sm:$0xff] %vm531_vm3, %v474_v34  ;;  %v494_v17 = vpop.permute.xlu2 %493 }
  0xc4   : > { %561 = vst.msk [vmem:[#allocation2 + $0xe8] sm:$0xff] %vm531_vm3, %v494_v17 }
  0xc7   : > { %707 = vrot.lane.b32.xlu0 %v2950_v63, %s2230_s5 }
  0xc8   : > { %776 = vrot.lane.b32.xlu1 %v2328_v2, %s2231_s6 }
  0xc9   : > { %v478_v44 = vpop.permute.xlu0 %477  ;;  %778 = vrot.lane.b32.xlu2 %v2333_v5, %s2231_s6 }
  0xca   : > { %553 = vst.msk [vmem:[#allocation2 + $0xa8] sm:$0xff] %vm531_vm3, %v478_v44  ;;  %v480_v40 = vpop.permute.xlu1 %479 }
  0xcb   : > { %554 = vst.msk [vmem:[#allocation2 + $0xb0] sm:$0xff] %vm531_vm3, %v480_v40  ;;  %v646_v57 = vpop.permute.xlu2 %645 }
  0xcc   : > { %742 = vst.msk [vmem:[#allocation2] sm:$0xff] %vm741_vm4, %v646_v57 }
  0xcf   : > { %780 = vrot.lane.b32.xlu0 %v2349_v12, %s2231_s6 }
  0xd0   : > { %782 = vrot.lane.b32.xlu1 %v2352_v13, %s2231_s6 }
  0xd1   : > { %v484_v2 = vpop.permute.xlu0 %483  ;;  %784 = vrot.lane.b32.xlu2 %v2373_v22, %s2231_s6 }
  0xd2   : > { %556 = vst.msk [vmem:[#allocation2 + $0xc0] sm:$0xff] %vm531_vm3, %v484_v2  ;;  %v486_v58 = vpop.permute.xlu1 %485 }
  0xd3   : > { %557 = vst.msk [vmem:[#allocation2 + $0xc8] sm:$0xff] %vm531_vm3, %v486_v58  ;;  %v652_v5 = vpop.permute.xlu2 %651 }
  0xd4   : > { %745 = vst.msk [vmem:[#allocation2 + $0x18] sm:$0xff] %vm741_vm4, %v652_v5 }
  0xd7   : > { %786 = vrot.lane.b32.xlu0 %v2376_v23, %s2231_s6 }
  0xd8   : > { %788 = vrot.lane.b32.xlu1 %v2392_v30, %s2231_s6 }
  0xd9   : > { %v490_v25 = vpop.permute.xlu0 %489  ;;  %790 = vrot.lane.b32.xlu2 %v2398_v32, %s2231_s6 }
  0xda   : > { %559 = vst.msk [vmem:[#allocation2 + $0xd8] sm:$0xff] %vm531_vm3, %v490_v25  ;;  %v492_v20 = vpop.permute.xlu1 %491 }
  0xdb   : > { %560 = vst.msk [vmem:[#allocation2 + $0xe0] sm:$0xff] %vm531_vm3, %v492_v20  ;;  %v658_v34 = vpop.permute.xlu2 %657 }
  0xdc   : > { %748 = vst.msk [vmem:[#allocation2 + $0x30] sm:$0xff] %vm741_vm4, %v658_v34 }
  0xdf   : > { %792 = vrot.lane.b32.xlu0 %v2410_v36, %s2231_s6 }
  0xe0   : > { %794 = vrot.lane.b32.xlu1 %v2413_v37, %s2231_s6 }
  0xe1   : > { %v496_v17 = vpop.permute.xlu0 %495  ;;  %796 = vrot.lane.b32.xlu2 %v2438_v46, %s2231_s6 }
  0xe2   : > { %562 = vst.msk [vmem:[#allocation2 + $0xf0] sm:$0xff] %vm531_vm3, %v496_v17  ;;  %v498_v44 = vpop.permute.xlu1 %497 }
  0xe3   : > { %563 = vst.msk [vmem:[#allocation2 + $0xf8] sm:$0xff] %vm531_vm3, %v498_v44  ;;  %v664_v40 = vpop.permute.xlu2 %663 }
  0xe4   : > { %751 = vst.msk [vmem:[#allocation2 + $0x48] sm:$0xff] %vm741_vm4, %v664_v40 }
  0xe7   : > { %798 = vrot.lane.b32.xlu0 %v2441_v47, %s2231_s6 }
  0xe8   : > { %800 = vrot.lane.b32.xlu1 %v2458_v54, %s2231_s6 }
  0xe9   : > { %v648_v57 = vpop.permute.xlu0 %647  ;;  %802 = vrot.lane.b32.xlu2 %v2464_v56, %s2231_s6 }
  0xea   : > { %743 = vst.msk [vmem:[#allocation2 + $0x8] sm:$0xff] %vm741_vm4, %v648_v57  ;;  %v650_v2 = vpop.permute.xlu1 %649 }
  0xeb   : > { %744 = vst.msk [vmem:[#allocation2 + $0x10] sm:$0xff] %vm741_vm4, %v650_v2  ;;  %v670_v58 = vpop.permute.xlu2 %669 }
  0xec   : > { %754 = vst.msk [vmem:[#allocation2 + $0x60] sm:$0xff] %vm741_vm4, %v670_v58 }
  0xef   : > { %804 = vrot.lane.b32.xlu0 %v2476_v60, %s2231_s6 }
  0xf0   : > { %806 = vrot.lane.b32.xlu1 %v2479_v61, %s2231_s6 }
  0xf1   : > { %v654_v5 = vpop.permute.xlu0 %653  ;;  %808 = vrot.lane.b32.xlu2 %v2504_v15, %s2231_s6 }
  0xf2   : > { %746 = vst.msk [vmem:[#allocation2 + $0x20] sm:$0xff] %vm741_vm4, %v654_v5  ;;  %v656_v25 = vpop.permute.xlu1 %655 }
  0xf3   : > { %747 = vst.msk [vmem:[#allocation2 + $0x28] sm:$0xff] %vm741_vm4, %v656_v25  ;;  %v676_v20 = vpop.permute.xlu2 %675 }
  0xf4   : > { %757 = vst.msk [vmem:[#allocation2 + $0x78] sm:$0xff] %vm741_vm4, %v676_v20 }
  0xf7   : > { %810 = vrot.lane.b32.xlu0 %v2507_v16, %s2231_s6 }
  0xf8   : > { %812 = vrot.lane.b32.xlu1 %v2524_v35, %s2231_s6 }
  0xf9   : > { %v660_v34 = vpop.permute.xlu0 %659  ;;  %814 = vrot.lane.b32.xlu2 %v2530_v39, %s2231_s6 }
  0xfa   : > { %749 = vst.msk [vmem:[#allocation2 + $0x38] sm:$0xff] %vm741_vm4, %v660_v34  ;;  %v662_v17 = vpop.permute.xlu1 %661 }
  0xfb   : > { %750 = vst.msk [vmem:[#allocation2 + $0x40] sm:$0xff] %vm741_vm4, %v662_v17  ;;  %v682_v44 = vpop.permute.xlu2 %681  ;;  %v3045_v17 = vld [vmem:[%s2319_s30 + $0x180] sm:$0xff] }
  0xfc   : > { %760 = vst.msk [vmem:[#allocation2 + $0x90] sm:$0xff] %vm741_vm4, %v682_v44 }
  0xff   : > { %816 = vrot.lane.b32.xlu0 %v2542_v50, %s2231_s6 }
 0x100   : > { %818 = vrot.lane.b32.xlu1 %v2545_v51, %s2231_s6 }
 0x101   : > { %v666_v40 = vpop.permute.xlu0 %665  ;;  %820 = vrot.lane.b32.xlu2 %v2570_v26, %s2231_s6 }
 0x102   : > { %752 = vst.msk [vmem:[#allocation2 + $0x50] sm:$0xff] %vm741_vm4, %v666_v40  ;;  %v668_v57 = vpop.permute.xlu1 %667 }
 0x103   : > { %753 = vst.msk [vmem:[#allocation2 + $0x58] sm:$0xff] %vm741_vm4, %v668_v57  ;;  %v688_v2 = vpop.permute.xlu2 %687  ;;  %v3053_v57 = vld [vmem:[%s2319_s30 + $0x188] sm:$0xff] }
 0x104   : > { %763 = vst.msk [vmem:[#allocation2 + $0xa8] sm:$0xff] %vm741_vm4, %v688_v2 }
 0x105   : > { %3978 = vst [vmem:[#allocation50_spill] sm:$0xff] %v3053_v57 }
 0x107   : > { %822 = vrot.lane.b32.xlu0 %v2573_v27, %s2231_s6 }
 0x108   : > { %824 = vrot.lane.b32.xlu1 %v2590_v38, %s2231_s6 }
 0x109   : > { %v672_v58 = vpop.permute.xlu0 %671  ;;  %826 = vrot.lane.b32.xlu2 %v2596_v14, %s2231_s6  ;;  %v3985_v14 = vld [vmem:[#allocation12_spill] sm:$0xff] }
 0x10a   : > { %755 = vst.msk [vmem:[#allocation2 + $0x68] sm:$0xff] %vm741_vm4, %v672_v58  ;;  %v674_v5 = vpop.permute.xlu1 %673 }
 0x10b   : > { %756 = vst.msk [vmem:[#allocation2 + $0x70] sm:$0xff] %vm741_vm4, %v674_v5  ;;  %v694_v25 = vpop.permute.xlu2 %693 }
 0x10c   : > { %766 = vst.msk [vmem:[#allocation2 + $0xc0] sm:$0xff] %vm741_vm4, %v694_v25 }
 0x10f   : > { %828 = vrot.lane.b32.xlu0 %v2608_v48, %s2231_s6 }
 0x110   : > { %830 = vrot.lane.b32.xlu1 %v2611_v9, %s2231_s6 }
 0x111   : > { %v678_v20 = vpop.permute.xlu0 %677  ;;  %832 = vrot.lane.b32.xlu2 %v2636_v24, %s2231_s6  ;;  %v3997_v24 = vld [vmem:[#allocation26_spill] sm:$0xff] }
 0x112   : > { %758 = vst.msk [vmem:[#allocation2 + $0x80] sm:$0xff] %vm741_vm4, %v678_v20  ;;  %v680_v34 = vpop.permute.xlu1 %679 }
 0x113   : > { %759 = vst.msk [vmem:[#allocation2 + $0x88] sm:$0xff] %vm741_vm4, %v680_v34  ;;  %v700_v44 = vpop.permute.xlu2 %699 }
 0x114   : > { %769 = vst.msk [vmem:[#allocation2 + $0xd8] sm:$0xff] %vm741_vm4, %v700_v44  ;;  %v3979_v44 = vld [vmem:[#allocation6_spill] sm:$0xff] }
 0x117   : > { %834 = vrot.lane.b32.xlu0 %v2639_v53, %s2231_s6  ;;  %v3988_v53 = vld [vmem:[#allocation15_spill] sm:$0xff] }
 0x118   : > { %836 = vrot.lane.b32.xlu1 %v3045_v17, %s2231_s6 }
 0x119   : > { %v684_v40 = vpop.permute.xlu0 %683  ;;  %838 = vrot.lane.b32.xlu2 %v3053_v57, %s2231_s6  ;;  %s2033_s6 = sshll.u32 %s2219_s15, 8 }
 0x11a   : > { %761 = vst.msk [vmem:[#allocation2 + $0x98] sm:$0xff] %vm741_vm4, %v684_v40  ;;  %v686_v2 = vpop.permute.xlu1 %685  ;;  %v3980_v40 = vld [vmem:[#allocation7_spill] sm:$0xff] }
 0x11b   : > { %762 = vst.msk [vmem:[#allocation2 + $0xa0] sm:$0xff] %vm741_vm4, %v686_v2  ;;  %v706_v58 = vpop.permute.xlu2 %705 }
 0x11c   : > { %772 = vst.msk [vmem:[#allocation2 + $0xf0] sm:$0xff] %vm741_vm4, %v706_v58 }
 0x11f   : > { %911 = vrot.lane.b32.xlu0 %v2346_v11, %s2232_s7 }
 0x120   : > { %913 = vrot.lane.b32.xlu1 %v2370_v21, %s2232_s7 }
 0x121   : > { %v690_v5 = vpop.permute.xlu0 %689  ;;  %915 = vrot.lane.b32.xlu2 %v2364_v19, %s2232_s7 }
 0x122   : > { %764 = vst.msk [vmem:[#allocation2 + $0xb0] sm:$0xff] %vm741_vm4, %v690_v5  ;;  %v692_v25 = vpop.permute.xlu1 %691  ;;  %v3981_v5 = vld [vmem:[#allocation8_spill] sm:$0xff] }
 0x123   : > { %765 = vst.msk [vmem:[#allocation2 + $0xb8] sm:$0xff] %vm741_vm4, %v692_v25  ;;  %v779_v20 = vpop.permute.xlu2 %778 }
 0x124   : > { %874 = vst.msk [vmem:[#allocation2 + $0x8] sm:$0xff] %vm872_vm5, %v779_v20  ;;  %v3982_v20 = vld [vmem:[#allocation9_spill] sm:$0xff] }
 0x127   : > { %917 = vrot.lane.b32.xlu0 %v2389_v29, %s2232_s7 }
 0x128   : > { %919 = vrot.lane.b32.xlu1 %v2395_v31, %s2232_s7 }
 0x129   : > { %v696_v11 = vpop.permute.xlu0 %695  ;;  %921 = vrot.lane.b32.xlu2 %v2403_v33, %s2232_s7 }
 0x12a   : > { %767 = vst.msk [vmem:[#allocation2 + $0xc8] sm:$0xff] %vm741_vm4, %v696_v11  ;;  %v698_v21 = vpop.permute.xlu1 %697  ;;  %v3983_v11 = vld [vmem:[#allocation10_spill] sm:$0xff] }
 0x12b   : > { %768 = vst.msk [vmem:[#allocation2 + $0xd0] sm:$0xff] %vm741_vm4, %v698_v21  ;;  %v785_v34 = vpop.permute.xlu2 %784 }
 0x12c   : > { %877 = vst.msk [vmem:[#allocation2 + $0x20] sm:$0xff] %vm872_vm5, %v785_v34 }
 0x12f   : > { %923 = vrot.lane.b32.xlu0 %v3979_v44, %s2232_s7 }
 0x130   : > { %925 = vrot.lane.b32.xlu1 %v3980_v40, %s2232_s7 }
 0x131   : > { %v702_v2 = vpop.permute.xlu0 %701  ;;  %927 = vrot.lane.b32.xlu2 %v3981_v5, %s2232_s7 }
 0x132   : > { %770 = vst.msk [vmem:[#allocation2 + $0xe0] sm:$0xff] %vm741_vm4, %v702_v2  ;;  %v704_v58 = vpop.permute.xlu1 %703  ;;  %v3984_v2 = vld [vmem:[#allocation11_spill] sm:$0xff] }
 0x133   : > { %771 = vst.msk [vmem:[#allocation2 + $0xe8] sm:$0xff] %vm741_vm4, %v704_v58  ;;  %v791_v25 = vpop.permute.xlu2 %790 }
 0x134   : > { %880 = vst.msk [vmem:[#allocation2 + $0x38] sm:$0xff] %vm872_vm5, %v791_v25  ;;  %v3986_v25 = vld [vmem:[#allocation13_spill] sm:$0xff] }
 0x137   : > { %929 = vrot.lane.b32.xlu0 %v3982_v20, %s2232_s7 }
 0x138   : > { %931 = vrot.lane.b32.xlu1 %v3983_v11, %s2232_s7 }
 0x139   : > { %v708_v21 = vpop.permute.xlu0 %707  ;;  %933 = vrot.lane.b32.xlu2 %v3984_v2, %s2232_s7 }
 0x13a   : > { %773 = vst.msk [vmem:[#allocation2 + $0xf8] sm:$0xff] %vm741_vm4, %v708_v21  ;;  %v777_v34 = vpop.permute.xlu1 %776  ;;  %v3987_v21 = vld [vmem:[#allocation14_spill] sm:$0xff] }
 0x13b   : > { %873 = vst.msk [vmem:[#allocation2] sm:$0xff] %vm872_vm5, %v777_v34  ;;  %v797_v58 = vpop.permute.xlu2 %796 }
 0x13c   : > { %883 = vst.msk [vmem:[#allocation2 + $0x50] sm:$0xff] %vm872_vm5, %v797_v58  ;;  %v3989_v58 = vld [vmem:[#allocation16_spill] sm:$0xff] }
 0x13f   : > { %935 = vrot.lane.b32.xlu0 %v3985_v14, %s2232_s7 }
 0x140   : > { %937 = vrot.lane.b32.xlu1 %v3986_v25, %s2232_s7 }
 0x141   : > { %v781_v20 = vpop.permute.xlu0 %780  ;;  %939 = vrot.lane.b32.xlu2 %v3987_v21, %s2232_s7  ;;  %v3991_v21 = vld [vmem:[#allocation18_spill] sm:$0xff] }
 0x142   : > { %875 = vst.msk [vmem:[#allocation2 + $0x10] sm:$0xff] %vm872_vm5, %v781_v20  ;;  %v783_v5 = vpop.permute.xlu1 %782 }
 0x143   : > { %876 = vst.msk [vmem:[#allocation2 + $0x18] sm:$0xff] %vm872_vm5, %v783_v5  ;;  %v803_v34 = vpop.permute.xlu2 %802  ;;  %v3990_v5 = vld [vmem:[#allocation17_spill] sm:$0xff] }
 0x144   : > { %886 = vst.msk [vmem:[#allocation2 + $0x68] sm:$0xff] %vm872_vm5, %v803_v34  ;;  %v3992_v34 = vld [vmem:[#allocation19_spill] sm:$0xff] }
 0x147   : > { %941 = vrot.lane.b32.xlu0 %v3988_v53, %s2232_s7 }
 0x148   : > { %943 = vrot.lane.b32.xlu1 %v3989_v58, %s2232_s7 }
 0x149   : > { %v787_v38 = vpop.permute.xlu0 %786  ;;  %945 = vrot.lane.b32.xlu2 %v3990_v5, %s2232_s7  ;;  %v3994_v5 = vld [vmem:[#allocation21_spill] sm:$0xff] }
 0x14a   : > { %878 = vst.msk [vmem:[#allocation2 + $0x28] sm:$0xff] %vm872_vm5, %v787_v38  ;;  %v789_v25 = vpop.permute.xlu1 %788  ;;  %v3993_v38 = vld [vmem:[#allocation20_spill] sm:$0xff] }
 0x14b   : > { %879 = vst.msk [vmem:[#allocation2 + $0x30] sm:$0xff] %vm872_vm5, %v789_v25  ;;  %v809_v20 = vpop.permute.xlu2 %808 }
 0x14c   : > { %889 = vst.msk [vmem:[#allocation2 + $0x80] sm:$0xff] %vm872_vm5, %v809_v20  ;;  %v3995_v20 = vld [vmem:[#allocation23_spill] sm:$0xff] }
 0x14f   : > { %947 = vrot.lane.b32.xlu0 %v3991_v21, %s2232_s7 }
 0x150   : > { %949 = vrot.lane.b32.xlu1 %v3992_v34, %s2232_s7 }
 0x151   : > { %v793_v53 = vpop.permute.xlu0 %792  ;;  %951 = vrot.lane.b32.xlu2 %v3993_v38, %s2232_s7 }
 0x152   : > { %881 = vst.msk [vmem:[#allocation2 + $0x40] sm:$0xff] %vm872_vm5, %v793_v53  ;;  %v795_v58 = vpop.permute.xlu1 %794 }
 0x153   : > { %882 = vst.msk [vmem:[#allocation2 + $0x48] sm:$0xff] %vm872_vm5, %v795_v58  ;;  %v815_v25 = vpop.permute.xlu2 %814  ;;  %v3996_v58 = vld [vmem:[#allocation25_spill] sm:$0xff] }
 0x154   : > { %892 = vst.msk [vmem:[#allocation2 + $0x98] sm:$0xff] %vm872_vm5, %v815_v25  ;;  %v3998_v25 = vld [vmem:[#allocation27_spill] sm:$0xff] }
 0x157   : > { %953 = vrot.lane.b32.xlu0 %v3994_v5, %s2232_s7 }
 0x158   : > { %955 = vrot.lane.b32.xlu1 %v3995_v20, %s2232_s7 }
 0x159   : > { %v799_v14 = vpop.permute.xlu0 %798  ;;  %957 = vrot.lane.b32.xlu2 %v3996_v58, %s2232_s7 }
 0x15a   : > { %884 = vst.msk [vmem:[#allocation2 + $0x58] sm:$0xff] %vm872_vm5, %v799_v14  ;;  %v801_v53 = vpop.permute.xlu1 %800  ;;  %v3999_v14 = vld [vmem:[#allocation28_spill] sm:$0xff] }
 0x15b   : > { %885 = vst.msk [vmem:[#allocation2 + $0x60] sm:$0xff] %vm872_vm5, %v801_v53  ;;  %v821_v40 = vpop.permute.xlu2 %820  ;;  %v3141_v53 = vld [vmem:[%s2319_s30 + $0x190] sm:$0x3] }
 0x15c   : > { %895 = vst.msk [vmem:[#allocation2 + $0xb0] sm:$0xff] %vm872_vm5, %v821_v40  ;;  %v906_v40 = vrot.slane %v3045_v17, 1 }
 0x15f   : > { %959 = vrot.lane.b32.xlu0 %v3997_v24, %s2232_s7 }
 0x160   : > { %961 = vrot.lane.b32.xlu1 %v3998_v25, %s2232_s7 }
 0x161   : > { %v805_v2 = vpop.permute.xlu0 %804  ;;  %963 = vrot.lane.b32.xlu2 %v3999_v14, %s2232_s7 }
 0x162   : > { %887 = vst.msk [vmem:[#allocation2 + $0x70] sm:$0xff] %vm872_vm5, %v805_v2  ;;  %v807_v44 = vpop.permute.xlu1 %806  ;;  %v907_v2 = vrot.slane %v3053_v57, 1 }
 0x163   : > { %888 = vst.msk [vmem:[#allocation2 + $0x78] sm:$0xff] %vm872_vm5, %v807_v44  ;;  %v827_v58 = vpop.permute.xlu2 %826  ;;  %v909_v44 = vrot.slane %v3141_v53, 1 }
 0x164   : > { %898 = vst.msk [vmem:[#allocation2 + $0xc8] sm:$0xff] %vm872_vm5, %v827_v58  ;;  %v3154_v20 = vsel %vm354_vm0, %v906_v40, %v907_v2 }
 0x165   : > { %4000 = vst [vmem:[#allocation10_spill] sm:$0xff] %v3154_v20  ;;  %v3159_v58 = vsel %vm354_vm0, %v907_v2, %v909_v44  ;;  %v4002_v44 = vld [vmem:[#allocation33_spill] sm:$0xff] }
 0x166   : > { %4001 = vst [vmem:[#allocation18_spill] sm:$0xff] %v3159_v58 }
 0x167   : > { %965 = vrot.lane.b32.xlu0 %v2653_v62, %s2232_s7 }
 0x168   : > { %967 = vrot.lane.b32.xlu1 %v2656_v6, %s2232_s7 }
 0x169   : > { %v811_v25 = vpop.permute.xlu0 %810  ;;  %969 = vrot.lane.b32.xlu2 %v2661_v55, %s2232_s7 }
 0x16a   : > { %890 = vst.msk [vmem:[#allocation2 + $0x88] sm:$0xff] %vm872_vm5, %v811_v25  ;;  %v813_v24 = vpop.permute.xlu1 %812 }
 0x16b   : > { %891 = vst.msk [vmem:[#allocation2 + $0x90] sm:$0xff] %vm872_vm5, %v813_v24  ;;  %v833_v6 = vpop.permute.xlu2 %832 }
 0x16c   : > { %901 = vst.msk [vmem:[#allocation2 + $0xe0] sm:$0xff] %vm872_vm5, %v833_v6 }
 0x16f   : > { %971 = vrot.lane.b32.xlu0 %v3154_v20, %s2232_s7 }
 0x170   : > { %973 = vrot.lane.b32.xlu1 %v3159_v58, %s2232_s7  ;;  %v4006_v58 = vld [vmem:[#allocation37_spill] sm:$0xff] }
 0x171   : > { %v817_v25 = vpop.permute.xlu0 %816  ;;  %1045 = vrot.lane.b32.xlu2 %v2686_v0, %s2233_s8 }
 0x172   : > { %893 = vst.msk [vmem:[#allocation2 + $0xa0] sm:$0xff] %vm872_vm5, %v817_v25  ;;  %v819_v24 = vpop.permute.xlu1 %818  ;;  %v4003_v25 = vld [vmem:[#allocation34_spill] sm:$0xff] }
 0x173   : > { %894 = vst.msk [vmem:[#allocation2 + $0xa8] sm:$0xff] %vm872_vm5, %v819_v24  ;;  %v839_v40 = vpop.permute.xlu2 %838 }
 0x174   : > { %904 = vst.msk [vmem:[#allocation2 + $0xf8] sm:$0xff] %vm872_vm5, %v839_v40 }
 0x177   : > { %1047 = vrot.lane.b32.xlu0 %v2706_v59, %s2233_s8  ;;  %v4004_v59 = vld [vmem:[#allocation35_spill] sm:$0xff] }
 0x178   : > { %1049 = vrot.lane.b32.xlu1 %v2713_v45, %s2233_s8 }
 0x179   : > { %v823_v6 = vpop.permute.xlu0 %822  ;;  %1051 = vrot.lane.b32.xlu2 %v4002_v44, %s2233_s8 }
 0x17a   : > { %896 = vst.msk [vmem:[#allocation2 + $0xb8] sm:$0xff] %vm872_vm5, %v823_v6  ;;  %v825_v2 = vpop.permute.xlu1 %824  ;;  %v4005_v6 = vld [vmem:[#allocation36_spill] sm:$0xff] }
 0x17b   : > { %897 = vst.msk [vmem:[#allocation2 + $0xc0] sm:$0xff] %vm872_vm5, %v825_v2  ;;  %v916_v0 = vpop.permute.xlu2 %915 }
 0x17c   : > { %1010 = vst.msk [vmem:[#allocation2 + $0x10] sm:$0xff] %vm1007_vm6, %v916_v0  ;;  %v4007_v0 = vld [vmem:[#allocation38_spill] sm:$0xff] }
 0x17f   : > { %1053 = vrot.lane.b32.xlu0 %v4003_v25, %s2233_s8 }
 0x180   : > { %1055 = vrot.lane.b32.xlu1 %v4004_v59, %s2233_s8 }
 0x181   : > { %v829_v24 = vpop.permute.xlu0 %828  ;;  %1057 = vrot.lane.b32.xlu2 %v4005_v6, %s2233_s8 }
 0x182   : > { %899 = vst.msk [vmem:[#allocation2 + $0xd0] sm:$0xff] %vm872_vm5, %v829_v24  ;;  %v831_v40 = vpop.permute.xlu1 %830  ;;  %v4008_v24 = vld [vmem:[#allocation39_spill] sm:$0xff] }
 0x183   : > { %900 = vst.msk [vmem:[#allocation2 + $0xd8] sm:$0xff] %vm872_vm5, %v831_v40  ;;  %v922_v2 = vpop.permute.xlu2 %921 }
 0x184   : > { %1013 = vst.msk [vmem:[#allocation2 + $0x28] sm:$0xff] %vm1007_vm6, %v922_v2 }
 0x187   : > { %1059 = vrot.lane.b32.xlu0 %v4006_v58, %s2233_s8 }
 0x188   : > { %1061 = vrot.lane.b32.xlu1 %v4007_v0, %s2233_s8 }
 0x189   : > { %v835_v20 = vpop.permute.xlu0 %834  ;;  %1063 = vrot.lane.b32.xlu2 %v4008_v24, %s2233_s8 }
 0x18a   : > { %902 = vst.msk [vmem:[#allocation2 + $0xe8] sm:$0xff] %vm872_vm5, %v835_v20  ;;  %v837_v55 = vpop.permute.xlu1 %836  ;;  %v4009_v20 = vld [vmem:[#allocation41_spill] sm:$0xff] }
 0x18b   : > { %903 = vst.msk [vmem:[#allocation2 + $0xf0] sm:$0xff] %vm872_vm5, %v837_v55  ;;  %v928_v40 = vpop.permute.xlu2 %927 }
 0x18c   : > { %1016 = vst.msk [vmem:[#allocation2 + $0x40] sm:$0xff] %vm1007_vm6, %v928_v40 }
 0x18f   : > { %1065 = vrot.lane.b32.xlu0 %v2811_v10, %s2233_s8 }
 0x190   : > { %1067 = vrot.lane.b32.xlu1 %v2816_v43, %s2233_s8 }
 0x191   : > { %v912_v2 = vpop.permute.xlu0 %911  ;;  %1069 = vrot.lane.b32.xlu2 %v2822_v49, %s2233_s8 }
 0x192   : > { %1008 = vst.msk [vmem:[#allocation2] sm:$0xff] %vm1007_vm6, %v912_v2  ;;  %v914_v0 = vpop.permute.xlu1 %913 }
 0x193   : > { %1009 = vst.msk [vmem:[#allocation2 + $0x8] sm:$0xff] %vm1007_vm6, %v914_v0  ;;  %v934_v55 = vpop.permute.xlu2 %933  ;;  %v4010_v0 = vld [vmem:[#allocation42_spill] sm:$0xff] }
 0x194   : > { %1019 = vst.msk [vmem:[#allocation2 + $0x58] sm:$0xff] %vm1007_vm6, %v934_v55 }
 0x197   : > { %1071 = vrot.lane.b32.xlu0 %v2834_v1, %s2233_s8 }
 0x198   : > { %1073 = vrot.lane.b32.xlu1 %v4009_v20, %s2233_s8 }
 0x199   : > { %v918_v40 = vpop.permute.xlu0 %917  ;;  %1075 = vrot.lane.b32.xlu2 %v4010_v0, %s2233_s8 }
 0x19a   : > { %1011 = vst.msk [vmem:[#allocation2 + $0x18] sm:$0xff] %vm1007_vm6, %v918_v40  ;;  %v920_v24 = vpop.permute.xlu1 %919 }
 0x19b   : > { %1012 = vst.msk [vmem:[#allocation2 + $0x20] sm:$0xff] %vm1007_vm6, %v920_v24  ;;  %v940_v2 = vpop.permute.xlu2 %939  ;;  %v4011_v24 = vld [vmem:[#allocation45_spill] sm:$0xff] }
 0x19c   : > { %1022 = vst.msk [vmem:[#allocation2 + $0x70] sm:$0xff] %vm1007_vm6, %v940_v2  ;;  %v4012_v2 = vld [vmem:[#allocation46_spill] sm:$0xff] }
 0x19f   : > { %1077 = vrot.lane.b32.xlu0 %v2857_v52, %s2233_s8 }
 0x1a0   : > { %1079 = vrot.lane.b32.xlu1 %v2862_v7, %s2233_s8 }
 0x1a1   : > { %v924_v55 = vpop.permute.xlu0 %923  ;;  %1081 = vrot.lane.b32.xlu2 %v4011_v24, %s2233_s8 }
 0x1a2   : > { %1014 = vst.msk [vmem:[#allocation2 + $0x30] sm:$0xff] %vm1007_vm6, %v924_v55  ;;  %v926_v20 = vpop.permute.xlu1 %925 }
 0x1a3   : > { %1015 = vst.msk [vmem:[#allocation2 + $0x38] sm:$0xff] %vm1007_vm6, %v926_v20  ;;  %v946_v40 = vpop.permute.xlu2 %945  ;;  %v4013_v20 = vld [vmem:[#allocation47_spill] sm:$0xff] }
 0x1a4   : > { %1025 = vst.msk [vmem:[#allocation2 + $0x88] sm:$0xff] %vm1007_vm6, %v946_v40 }
 0x1a7   : > { %1083 = vrot.lane.b32.xlu0 %v2879_v3, %s2233_s8 }
 0x1a8   : > { %1085 = vrot.lane.b32.xlu1 %v4012_v2, %s2233_s8 }
 0x1a9   : > { %v930_v52 = vpop.permute.xlu0 %929  ;;  %1087 = vrot.lane.b32.xlu2 %v4013_v20, %s2233_s8 }
 0x1aa   : > { %1017 = vst.msk [vmem:[#allocation2 + $0x48] sm:$0xff] %vm1007_vm6, %v930_v52  ;;  %v932_v7 = vpop.permute.xlu1 %931  ;;  %v4014_v52 = vld [vmem:[#allocation48_spill] sm:$0xff] }
 0x1ab   : > { %1018 = vst.msk [vmem:[#allocation2 + $0x50] sm:$0xff] %vm1007_vm6, %v932_v7  ;;  %v952_v55 = vpop.permute.xlu2 %951 }
 0x1ac   : > { %1028 = vst.msk [vmem:[#allocation2 + $0xa0] sm:$0xff] %vm1007_vm6, %v952_v55 }
 0x1af   : > { %1089 = vrot.lane.b32.xlu0 %v2902_v28, %s2233_s8 }
 0x1b0   : > { %1091 = vrot.lane.b32.xlu1 %v2907_v4, %s2233_s8 }
 0x1b1   : > { %v936_v40 = vpop.permute.xlu0 %935  ;;  %1093 = vrot.lane.b32.xlu2 %v4014_v52, %s2233_s8  ;;  %v1041_v52 = vrot.slane %v3053_v57, 2 }
 0x1b2   : > { %1020 = vst.msk [vmem:[#allocation2 + $0x60] sm:$0xff] %vm1007_vm6, %v936_v40  ;;  %v938_v0 = vpop.permute.xlu1 %937 }
 0x1b3   : > { %1021 = vst.msk [vmem:[#allocation2 + $0x68] sm:$0xff] %vm1007_vm6, %v938_v0  ;;  %v958_v7 = vpop.permute.xlu2 %957  ;;  %v1040_v0 = vrot.slane %v3045_v17, 2 }
 0x1b4   : > { %1031 = vst.msk [vmem:[#allocation2 + $0xb8] sm:$0xff] %vm1007_vm6, %v958_v7  ;;  %v1043_v7 = vrot.slane %v3141_v53, 2 }
 0x1b6   : > { %v3265_v57 = vsel %vm564_vm2, %v1041_v52, %v1043_v7 }
 0x1b7   : > { %1095 = vrot.lane.b32.xlu0 %v2924_v18, %s2233_s8 }
 0x1b8   : > { %1097 = vrot.lane.b32.xlu1 %v2929_v8, %s2233_s8 }
 0x1b9   : > { %v942_v55 = vpop.permute.xlu0 %941  ;;  %1099 = vrot.lane.b32.xlu2 %v2934_v41, %s2233_s8 }
 0x1ba   : > { %1023 = vst.msk [vmem:[#allocation2 + $0x78] sm:$0xff] %vm1007_vm6, %v942_v55  ;;  %v944_v1 = vpop.permute.xlu1 %943 }
 0x1bb   : > { %1024 = vst.msk [vmem:[#allocation2 + $0x80] sm:$0xff] %vm1007_vm6, %v944_v1  ;;  %v964_v40 = vpop.permute.xlu2 %963  ;;  %v3260_v1 = vsel %vm564_vm2, %v1040_v0, %v1041_v52 }
 0x1bc   : > { %1034 = vst.msk [vmem:[#allocation2 + $0xd0] sm:$0xff] %vm1007_vm6, %v964_v40 }
 0x1bf   : > { %1101 = vrot.lane.b32.xlu0 %v2945_v42, %s2233_s8 }
 0x1c0   : > { %1103 = vrot.lane.b32.xlu1 %v2950_v63, %s2233_s8 }
 0x1c1   : > { %v948_v55 = vpop.permute.xlu0 %947  ;;  %1105 = vrot.lane.b32.xlu2 %v3260_v1, %s2233_s8 }
 0x1c2   : > { %1026 = vst.msk [vmem:[#allocation2 + $0x90] sm:$0xff] %vm1007_vm6, %v948_v55  ;;  %v950_v18 = vpop.permute.xlu1 %949 }
 0x1c3   : > { %1027 = vst.msk [vmem:[#allocation2 + $0x98] sm:$0xff] %vm1007_vm6, %v950_v18  ;;  %v970_v40 = vpop.permute.xlu2 %969 }
 0x1c4   : > { %1037 = vst.msk [vmem:[#allocation2 + $0xe8] sm:$0xff] %vm1007_vm6, %v970_v40 }
 0x1c7   : > { %1107 = vrot.lane.b32.xlu0 %v3265_v57, %s2233_s8  ;;  %s1915_s8 = scalar_lea.hbm %s3850_s3, %s2033_s6 }
 0x1c8   : > { %1176 = vrot.lane.b32.xlu1 %v2349_v12, %s2234_s9 }
 0x1c9   : > { %v954_v53 = vpop.permute.xlu0 %953  ;;  %1178 = vrot.lane.b32.xlu2 %v2352_v13, %s2234_s9 }
 0x1ca   : > { %1029 = vst.msk [vmem:[#allocation2 + $0xa8] sm:$0xff] %vm1007_vm6, %v954_v53  ;;  %v956_v18 = vpop.permute.xlu1 %955  ;;  %v4017_v53 = vld [vmem:[#allocation11_spill] sm:$0xff] }
 0x1cb   : > { %1030 = vst.msk [vmem:[#allocation2 + $0xb0] sm:$0xff] %vm1007_vm6, %v956_v18  ;;  %v1046_v52 = vpop.permute.xlu2 %1045 }
 0x1cc   : > { %1142 = vst.msk [vmem:[#allocation2] sm:$0xff] %vm1141_vm7, %v1046_v52 }
 0x1cf   : > { %1180 = vrot.lane.b32.xlu0 %v2373_v22, %s2234_s9 }
 0x1d0   : > { %1182 = vrot.lane.b32.xlu1 %v2376_v23, %s2234_s9 }
 0x1d1   : > { %v960_v12 = vpop.permute.xlu0 %959  ;;  %1184 = vrot.lane.b32.xlu2 %v2392_v30, %s2234_s9 }
 0x1d2   : > { %1032 = vst.msk [vmem:[#allocation2 + $0xc0] sm:$0xff] %vm1007_vm6, %v960_v12  ;;  %v962_v0 = vpop.permute.xlu1 %961 }
 0x1d3   : > { %1033 = vst.msk [vmem:[#allocation2 + $0xc8] sm:$0xff] %vm1007_vm6, %v962_v0  ;;  %v1052_v13 = vpop.permute.xlu2 %1051  ;;  %v4019_v0 = vld [vmem:[#allocation25_spill] sm:$0xff] }
 0x1d4   : > { %1145 = vst.msk [vmem:[#allocation2 + $0x18] sm:$0xff] %vm1141_vm7, %v1052_v13  ;;  %v4020_v13 = vld [vmem:[#allocation31_spill] sm:$0xff] }
 0x1d7   : > { %1186 = vrot.lane.b32.xlu0 %v2398_v32, %s2234_s9 }
 0x1d8   : > { %1188 = vrot.lane.b32.xlu1 %v2410_v36, %s2234_s9 }
 0x1d9   : > { %v966_v22 = vpop.permute.xlu0 %965  ;;  %1190 = vrot.lane.b32.xlu2 %v2413_v37, %s2234_s9 }
 0x1da   : > { %1035 = vst.msk [vmem:[#allocation2 + $0xd8] sm:$0xff] %vm1007_vm6, %v966_v22  ;;  %v968_v23 = vpop.permute.xlu1 %967 }
 0x1db   : > { %1036 = vst.msk [vmem:[#allocation2 + $0xe0] sm:$0xff] %vm1007_vm6, %v968_v23  ;;  %v1058_v7 = vpop.permute.xlu2 %1057  ;;  %v4021_v23 = vld [vmem:[#allocation7_spill] sm:$0xff] }
 0x1dc   : > { %1148 = vst.msk [vmem:[#allocation2 + $0x30] sm:$0xff] %vm1141_vm7, %v1058_v7 }
 0x1df   : > { %1192 = vrot.lane.b32.xlu0 %v2438_v46, %s2234_s9 }
 0x1e0   : > { %1194 = vrot.lane.b32.xlu1 %v2441_v47, %s2234_s9 }
 0x1e1   : > { %v972_v30 = vpop.permute.xlu0 %971  ;;  %1196 = vrot.lane.b32.xlu2 %v2458_v54, %s2234_s9 }
 0x1e2   : > { %1038 = vst.msk [vmem:[#allocation2 + $0xf0] sm:$0xff] %vm1007_vm6, %v972_v30  ;;  %v974_v32 = vpop.permute.xlu1 %973 }
 0x1e3   : > { %1039 = vst.msk [vmem:[#allocation2 + $0xf8] sm:$0xff] %vm1007_vm6, %v974_v32  ;;  %v1064_v36 = vpop.permute.xlu2 %1063  ;;  %v4022_v32 = vld [vmem:[#allocation12_spill] sm:$0xff] }
 0x1e4   : > { %1151 = vst.msk [vmem:[#allocation2 + $0x48] sm:$0xff] %vm1141_vm7, %v1064_v36 }
 0x1e7   : > { %1198 = vrot.lane.b32.xlu0 %v2464_v56, %s2234_s9 }
 0x1e8   : > { %1200 = vrot.lane.b32.xlu1 %v2476_v60, %s2234_s9 }
 0x1e9   : > { %v1048_v37 = vpop.permute.xlu0 %1047  ;;  %1202 = vrot.lane.b32.xlu2 %v2479_v61, %s2234_s9 }
 0x1ea   : > { %1143 = vst.msk [vmem:[#allocation2 + $0x8] sm:$0xff] %vm1141_vm7, %v1048_v37  ;;  %v1050_v46 = vpop.permute.xlu1 %1049 }
 0x1eb   : > { %1144 = vst.msk [vmem:[#allocation2 + $0x10] sm:$0xff] %vm1141_vm7, %v1050_v46  ;;  %v1070_v47 = vpop.permute.xlu2 %1069 }
 0x1ec   : > { %1154 = vst.msk [vmem:[#allocation2 + $0x60] sm:$0xff] %vm1141_vm7, %v1070_v47 }
 0x1ef   : > { %1204 = vrot.lane.b32.xlu0 %v2504_v15, %s2234_s9 }
 0x1f0   : > { %1206 = vrot.lane.b32.xlu1 %v2507_v16, %s2234_s9 }
 0x1f1   : > { %v1054_v54 = vpop.permute.xlu0 %1053  ;;  %1208 = vrot.lane.b32.xlu2 %v2524_v35, %s2234_s9 }
 0x1f2   : > { %1146 = vst.msk [vmem:[#allocation2 + $0x20] sm:$0xff] %vm1141_vm7, %v1054_v54  ;;  %v1056_v56 = vpop.permute.xlu1 %1055  ;;  %v4025_v54 = vld [vmem:[#allocation26_spill] sm:$0xff] }
 0x1f3   : > { %1147 = vst.msk [vmem:[#allocation2 + $0x28] sm:$0xff] %vm1141_vm7, %v1056_v56  ;;  %v1076_v60 = vpop.permute.xlu2 %1075 }
 0x1f4   : > { %1157 = vst.msk [vmem:[#allocation2 + $0x78] sm:$0xff] %vm1141_vm7, %v1076_v60 }
 0x1f7   : > { %1210 = vrot.lane.b32.xlu0 %v2530_v39, %s2234_s9 }
 0x1f8   : > { %1212 = vrot.lane.b32.xlu1 %v2542_v50, %s2234_s9 }
 0x1f9   : > { %v1060_v61 = vpop.permute.xlu0 %1059  ;;  %1214 = vrot.lane.b32.xlu2 %v2545_v51, %s2234_s9 }
 0x1fa   : > { %1149 = vst.msk [vmem:[#allocation2 + $0x38] sm:$0xff] %vm1141_vm7, %v1060_v61  ;;  %v1062_v15 = vpop.permute.xlu1 %1061  ;;  %v4026_v61 = vld [vmem:[#allocation32_spill] sm:$0xff] }
 0x1fb   : > { %1150 = vst.msk [vmem:[#allocation2 + $0x40] sm:$0xff] %vm1141_vm7, %v1062_v15  ;;  %v1082_v16 = vpop.permute.xlu2 %1081 }
 0x1fc   : > { %1160 = vst.msk [vmem:[#allocation2 + $0x90] sm:$0xff] %vm1141_vm7, %v1082_v16 }
 0x1ff   : > { %1216 = vrot.lane.b32.xlu0 %v2570_v26, %s2234_s9 }
 0x200   : > { %1218 = vrot.lane.b32.xlu1 %v2573_v27, %s2234_s9 }
 0x201   : > { %v1066_v35 = vpop.permute.xlu0 %1065  ;;  %1343 = vrot.lane.b32.xlu2 %v3991_v21, %s2235_s10 }
 0x202   : > { %1152 = vst.msk [vmem:[#allocation2 + $0x50] sm:$0xff] %vm1141_vm7, %v1066_v35  ;;  %v1068_v39 = vpop.permute.xlu1 %1067  ;;  %v2237_v35 = vmov 0.0  }
 0x203   : > { %1153 = vst.msk [vmem:[#allocation2 + $0x58] sm:$0xff] %vm1141_vm7, %v1068_v39  ;;  %v1088_v50 = vpop.permute.xlu2 %1087  ;;  %v4028_v39 = vld [vmem:[#allocation8_spill] sm:$0xff] }
 0x204   : > { %1163 = vst.msk [vmem:[#allocation2 + $0xa8] sm:$0xff] %vm1141_vm7, %v1088_v50 }
 0x207   : > { %1477 = vrot.lane.b32.xlu0 %v4011_v24, %s2236_s11 }
 0x208   : > { %1311 = vrot.lane.b32.xlu1 %v2364_v19, %s2235_s10 }
 0x209   : > { %v1072_v51 = vpop.permute.xlu0 %1071  ;;  %1445 = vrot.lane.b32.xlu2 %v2713_v45, %s2236_s11 }
 0x20a   : > { %1155 = vst.msk [vmem:[#allocation2 + $0x68] sm:$0xff] %vm1141_vm7, %v1072_v51  ;;  %v1074_v26 = vpop.permute.xlu1 %1073  ;;  %v4030_v51 = vld [vmem:[#allocation24_spill] sm:$0xff] }
 0x20b   : > { %1156 = vst.msk [vmem:[#allocation2 + $0x70] sm:$0xff] %vm1141_vm7, %v1074_v26  ;;  %v1094_v27 = vpop.permute.xlu2 %1093 }
 0x20c   : > { %1166 = vst.msk [vmem:[#allocation2 + $0xc0] sm:$0xff] %vm1141_vm7, %v1094_v27 }
 0x20f   : > { %1345 = vrot.lane.b32.xlu0 %v3992_v34, %s2235_s10 }
 0x210   : > { %1479 = vrot.lane.b32.xlu1 %v2879_v3, %s2236_s11 }
 0x211   : > { %v1078_v21 = vpop.permute.xlu0 %1077  ;;  %1313 = vrot.lane.b32.xlu2 %v2389_v29, %s2235_s10 }
 0x212   : > { %1158 = vst.msk [vmem:[#allocation2 + $0x80] sm:$0xff] %vm1141_vm7, %v1078_v21  ;;  %v1080_v19 = vpop.permute.xlu1 %1079  ;;  %v4031_v21 = vld [vmem:[#allocation38_spill] sm:$0xff] }
 0x213   : > { %1159 = vst.msk [vmem:[#allocation2 + $0x88] sm:$0xff] %vm1141_vm7, %v1080_v19  ;;  %v1100_v24 = vpop.permute.xlu2 %1099 }
 0x214   : > { %1169 = vst.msk [vmem:[#allocation2 + $0xd8] sm:$0xff] %vm1141_vm7, %v1100_v24  ;;  %v4032_v24 = vld [vmem:[#allocation40_spill] sm:$0xff] }
 0x217   : > { %1447 = vrot.lane.b32.xlu0 %v4002_v44, %s2236_s11 }
 0x218   : > { %1347 = vrot.lane.b32.xlu1 %v3993_v38, %s2235_s10 }
 0x219   : > { %v1084_v45 = vpop.permute.xlu0 %1083  ;;  %1481 = vrot.lane.b32.xlu2 %v4012_v2, %s2236_s11 }
 0x21a   : > { %1161 = vst.msk [vmem:[#allocation2 + $0x98] sm:$0xff] %vm1141_vm7, %v1084_v45  ;;  %v1086_v3 = vpop.permute.xlu1 %1085 }
 0x21b   : > { %1162 = vst.msk [vmem:[#allocation2 + $0xa0] sm:$0xff] %vm1141_vm7, %v1086_v3  ;;  %v1106_v34 = vpop.permute.xlu2 %1105 }
 0x21c   : > { %1172 = vst.msk [vmem:[#allocation2 + $0xf0] sm:$0xff] %vm1141_vm7, %v1106_v34  ;;  %v4033_v34 = vld [vmem:[#allocation27_spill] sm:$0xff] }
 0x21f   : > { %1315 = vrot.lane.b32.xlu0 %v2395_v31, %s2235_s10 }
 0x220   : > { %1224 = vrot.lane.b32.xlu1 %v2608_v48, %s2234_s9 }
 0x221   : > { %v1090_v29 = vpop.permute.xlu0 %1089  ;;  %1449 = vrot.lane.b32.xlu2 %v4003_v25, %s2236_s11 }
 0x222   : > { %1164 = vst.msk [vmem:[#allocation2 + $0xb0] sm:$0xff] %vm1141_vm7, %v1090_v29  ;;  %v1092_v38 = vpop.permute.xlu1 %1091 }
 0x223   : > { %1165 = vst.msk [vmem:[#allocation2 + $0xb8] sm:$0xff] %vm1141_vm7, %v1092_v38  ;;  %v1179_v44 = vpop.permute.xlu2 %1178  ;;  %v4035_v38 = vld [vmem:[#allocation49_spill] sm:$0xff] }
 0x224   : > { %1274 = vst.msk [vmem:[#allocation2 + $0x8] sm:$0xff] %vm1272_vm8, %v1179_v44 }
 0x227   : > { %1349 = vrot.lane.b32.xlu0 %v3994_v5, %s2235_s10 }
 0x228   : > { %1359 = vrot.lane.b32.xlu1 %v3999_v14, %s2235_s10 }
 0x229   : > { %v1096_v31 = vpop.permute.xlu0 %1095  ;;  %1483 = vrot.lane.b32.xlu2 %v4013_v20, %s2236_s11 }
 0x22a   : > { %1167 = vst.msk [vmem:[#allocation2 + $0xc8] sm:$0xff] %vm1141_vm7, %v1096_v31  ;;  %v1098_v48 = vpop.permute.xlu1 %1097 }
 0x22b   : > { %1168 = vst.msk [vmem:[#allocation2 + $0xd0] sm:$0xff] %vm1141_vm7, %v1098_v48  ;;  %v1185_v25 = vpop.permute.xlu2 %1184  ;;  %v4036_v48 = vld [vmem:[#allocation9_spill] sm:$0xff] }
 0x22c   : > { %1277 = vst.msk [vmem:[#allocation2 + $0x20] sm:$0xff] %vm1272_vm8, %v1185_v25 }
 0x22f   : > { %1493 = vrot.lane.b32.xlu0 %v2929_v8, %s2236_s11 }
 0x230   : > { %1317 = vrot.lane.b32.xlu1 %v2403_v33, %s2235_s10 }
 0x231   : > { %v1102_v5 = vpop.permute.xlu0 %1101  ;;  %1327 = vrot.lane.b32.xlu2 %v3983_v11, %s2235_s10  ;;  %v4015_v11 = vld [vmem:[#allocation23_spill] sm:$0xff] }
 0x232   : > { %1170 = vst.msk [vmem:[#allocation2 + $0xe0] sm:$0xff] %vm1141_vm7, %v1102_v5  ;;  %v1104_v14 = vpop.permute.xlu1 %1103  ;;  %v4037_v5 = vld [vmem:[#allocation14_spill] sm:$0xff] }
 0x233   : > { %1171 = vst.msk [vmem:[#allocation2 + $0xe8] sm:$0xff] %vm1141_vm7, %v1104_v14  ;;  %v1191_v2 = vpop.permute.xlu2 %1190 }
 0x234   : > { %1280 = vst.msk [vmem:[#allocation2 + $0x38] sm:$0xff] %vm1272_vm8, %v1191_v2 }
 0x237   : > { %1226 = vrot.lane.b32.xlu0 %v2611_v9, %s2234_s9 }
 0x238   : > { %1451 = vrot.lane.b32.xlu1 %v4004_v59, %s2236_s11 }
 0x239   : > { %v1108_v8 = vpop.permute.xlu0 %1107  ;;  %1461 = vrot.lane.b32.xlu2 %v2811_v10, %s2236_s11  ;;  %v4016_v10 = vld [vmem:[#allocation6_spill] sm:$0xff] }
 0x23a   : > { %1173 = vst.msk [vmem:[#allocation2 + $0xf8] sm:$0xff] %vm1141_vm7, %v1108_v8  ;;  %v1177_v33 = vpop.permute.xlu1 %1176  ;;  %v4039_v8 = vld [vmem:[#allocation39_spill] sm:$0xff] }
 0x23b   : > { %1273 = vst.msk [vmem:[#allocation2] sm:$0xff] %vm1272_vm8, %v1177_v33  ;;  %v1197_v20 = vpop.permute.xlu2 %1196 }
 0x23c   : > { %1283 = vst.msk [vmem:[#allocation2 + $0x50] sm:$0xff] %vm1272_vm8, %v1197_v20  ;;  %v4040_v20 = vld [vmem:[#allocation41_spill] sm:$0xff] }
 0x23f   : > { %1351 = vrot.lane.b32.xlu0 %v4015_v11, %s2235_s10 }
 0x240   : > { %1361 = vrot.lane.b32.xlu1 %v2653_v62, %s2235_s10 }
 0x241   : > { %v1181_v9 = vpop.permute.xlu0 %1180  ;;  %1485 = vrot.lane.b32.xlu2 %v2902_v28, %s2236_s11  ;;  %v4018_v28 = vld [vmem:[#allocation29_spill] sm:$0xff] }
 0x242   : > { %1275 = vst.msk [vmem:[#allocation2 + $0x10] sm:$0xff] %vm1272_vm8, %v1181_v9  ;;  %v1183_v59 = vpop.permute.xlu1 %1182 }
 0x243   : > { %1276 = vst.msk [vmem:[#allocation2 + $0x18] sm:$0xff] %vm1272_vm8, %v1183_v59  ;;  %v1203_v55 = vpop.permute.xlu2 %1202  ;;  %v1654_v59 = vld [vmem:[%s3848_s1 + $0x78] sm:$0xff] }
 0x244   : > { %1286 = vst.msk [vmem:[#allocation2 + $0x68] sm:$0xff] %vm1272_vm8, %v1203_v55  ;;  %v1653_v55 = vld [vmem:[%s3848_s1 + $0x70] sm:$0xff]  ;;  %1659 = vmatpush.msra.mxu0 %v1654_v59  ;;  %2035 = vmatpush.msra.mxu2 %v1654_v59 }
 0x245   : > { %2034 = vmatpush.msra.mxu1 %v1654_v59  ;;  %2036 = vmatpush.msra.mxu3 %v1654_v59 }
 0x246   : > { %1660 = vmatpush.msra.mxu0 %v1653_v55  ;;  %2038 = vmatpush.msra.mxu2 %v1653_v55 }
 0x247   : > { %1495 = vrot.lane.b32.xlu0 %v2934_v41, %s2236_s11  ;;  %2037 = vmatpush.msra.mxu1 %v1653_v55 }
 0x248   : > { %1319 = vrot.lane.b32.xlu1 %v4016_v10, %s2235_s10  ;;  %v1652_v10 = vld [vmem:[%s3848_s1 + $0x68] sm:$0xff]  ;;  %2039 = vmatpush.msra.mxu3 %v1653_v55 }
 0x249   : > { %v1187_v40 = vpop.permute.xlu0 %1186  ;;  %1329 = vrot.lane.b32.xlu2 %v4017_v53, %s2235_s10  ;;  %1661 = vmatpush.msra.mxu0 %v1652_v10  ;;  %v4042_v53 = vld [vmem:[#allocation15_spill] sm:$0xff] }
 0x24a   : > { %1278 = vst.msk [vmem:[#allocation2 + $0x28] sm:$0xff] %vm1272_vm8, %v1187_v40  ;;  %v1189_v62 = vpop.permute.xlu1 %1188  ;;  %v4041_v40 = vld [vmem:[#allocation18_spill] sm:$0xff]  ;;  %2041 = vmatpush.msra.mxu2 %v1652_v10  ;;  %2040 = vmatpush.msra.mxu1 %v1652_v10 }
 0x24b   : > { %1279 = vst.msk [vmem:[#allocation2 + $0x30] sm:$0xff] %vm1272_vm8, %v1189_v62  ;;  %v1209_v18 = vpop.permute.xlu2 %1208  ;;  %2042 = vmatpush.msra.mxu3 %v1652_v10 }
 0x24c   : > { %1289 = vst.msk [vmem:[#allocation2 + $0x80] sm:$0xff] %vm1272_vm8, %v1209_v18 }
 0x24f   : > { %1228 = vrot.lane.b32.xlu0 %v4018_v28, %s2234_s9  ;;  %v1651_v28 = vld [vmem:[%s3848_s1 + $0x60] sm:$0xff] }
 0x250   : > { %1453 = vrot.lane.b32.xlu1 %v4005_v6, %s2236_s11  ;;  %1662 = vmatpush.msra.mxu0 %v1651_v28 }
 0x251   : > { %v1193_v41 = vpop.permute.xlu0 %1192  ;;  %1463 = vrot.lane.b32.xlu2 %v2816_v43, %s2236_s11  ;;  %2044 = vmatpush.msra.mxu2 %v1651_v28 }
 0x252   : > { %1281 = vst.msk [vmem:[#allocation2 + $0x40] sm:$0xff] %vm1272_vm8, %v1193_v41  ;;  %v1195_v52 = vpop.permute.xlu1 %1194  ;;  %v3558_v41 = vld [vmem:[%s2319_s30 + $0x198] sm:$0xff]  ;;  %2043 = vmatpush.msra.mxu1 %v1651_v28  ;;  %2045 = vmatpush.msra.mxu3 %v1651_v28 }
 0x253   : > { %1282 = vst.msk [vmem:[#allocation2 + $0x48] sm:$0xff] %vm1272_vm8, %v1195_v52  ;;  %v1215_v12 = vpop.permute.xlu2 %1214  ;;  %v3561_v52 = vld [vmem:[%s2319_s30 + $0x1a0] sm:$0xff] }
 0x254   : > { %1292 = vst.msk [vmem:[#allocation2 + $0x98] sm:$0xff] %vm1272_vm8, %v1215_v12  ;;  %v1650_v12 = vld [vmem:[%s3848_s1 + $0x58] sm:$0xff] }
 0x255   : > { %1663 = vmatpush.msra.mxu0 %v1650_v12  ;;  %2047 = vmatpush.msra.mxu2 %v1650_v12 }
 0x256   : > { %2046 = vmatpush.msra.mxu1 %v1650_v12  ;;  %2048 = vmatpush.msra.mxu3 %v1650_v12 }
 0x257   : > { %1353 = vrot.lane.b32.xlu0 %v4019_v0, %s2235_s10  ;;  %v1306_v0 = vrot.slane %v3558_v41, 1 }
 0x258   : > { %1363 = vrot.lane.b32.xlu1 %v4020_v13, %s2235_s10  ;;  %v1307_v13 = vrot.slane %v3561_v52, 1 }
 0x259   : > { %v1199_v22 = vpop.permute.xlu0 %1198  ;;  %1487 = vrot.lane.b32.xlu2 %v2907_v4, %s2236_s11  ;;  %v4023_v4 = vld [vmem:[#allocation22_spill] sm:$0xff] }
 0x25a   : > { %1284 = vst.msk [vmem:[#allocation2 + $0x58] sm:$0xff] %vm1272_vm8, %v1199_v22  ;;  %v1201_v6 = vpop.permute.xlu1 %1200  ;;  %v1649_v22 = vld [vmem:[%s3848_s1 + $0x50] sm:$0xff] }
 0x25b   : > { %1285 = vst.msk [vmem:[#allocation2 + $0x60] sm:$0xff] %vm1272_vm8, %v1201_v6  ;;  %v1344_v43 = vpop.permute.xlu2 %1343  ;;  %v1308_v6 = vsel %vm354_vm0, %v1306_v0, %v1307_v13  ;;  %1664 = vmatpush.msra.mxu0 %v1649_v22  ;;  %2050 = vmatpush.msra.mxu2 %v1649_v22 }
 0x25c   : > { %1424 = vst.msk [vmem:[#allocation2 + $0x80] sm:$0xff] %vm1407_vm9, %v1344_v43  ;;  %v1648_v43 = vld [vmem:[%s3848_s1 + $0x48] sm:$0xff]  ;;  %2049 = vmatpush.msra.mxu1 %v1649_v22  ;;  %2051 = vmatpush.msra.mxu3 %v1649_v22 }
 0x25d   : > { %1665 = vmatpush.msra.mxu0 %v1648_v43  ;;  %2053 = vmatpush.msra.mxu2 %v1648_v43 }
 0x25e   : > { %2052 = vmatpush.msra.mxu1 %v1648_v43  ;;  %2054 = vmatpush.msra.mxu3 %v1648_v43 }
 0x25f   : > { %1497 = vrot.lane.b32.xlu0 %v2945_v42, %s2236_s11  ;;  %v4024_v42 = vld [vmem:[#allocation30_spill] sm:$0xff] }
 0x260   : > { %1321 = vrot.lane.b32.xlu1 %v4021_v23, %s2235_s10  ;;  %v4043_v23 = vld [vmem:[#allocation42_spill] sm:$0xff] }
 0x261   : > { %v1205_v7 = vpop.permute.xlu0 %1204  ;;  %1331 = vrot.lane.b32.xlu2 %v4022_v32, %s2235_s10  ;;  %v1647_v32 = vld [vmem:[%s3848_s1 + $0x40] sm:$0xff] }
 0x262   : > { %1287 = vst.msk [vmem:[#allocation2 + $0x70] sm:$0xff] %vm1272_vm8, %v1205_v7  ;;  %v1207_v30 = vpop.permute.xlu1 %1206  ;;  %1666 = vmatpush.msra.mxu0 %v1647_v32  ;;  %2056 = vmatpush.msra.mxu2 %v1647_v32 }
 0x263   : > { %1288 = vst.msk [vmem:[#allocation2 + $0x78] sm:$0xff] %vm1272_vm8, %v1207_v30  ;;  %v1446_v36 = vpop.permute.xlu2 %1445  ;;  %2055 = vmatpush.msra.mxu1 %v1647_v32  ;;  %2057 = vmatpush.msra.mxu3 %v1647_v32 }
 0x267   : > { %1220 = vrot.lane.b32.xlu0 %v4023_v4, %s2234_s9  ;;  %v1646_v4 = vld [vmem:[%s3848_s1 + $0x38] sm:$0xff] }
 0x268   : > { %1230 = vrot.lane.b32.xlu1 %v4024_v42, %s2234_s9  ;;  %v1645_v42 = vld [vmem:[%s3848_s1 + $0x30] sm:$0xff]  ;;  %1667 = vmatpush.msra.mxu0 %v1646_v4 }
 0x269   : > { %v1211_v37 = vpop.permute.xlu0 %1210  ;;  %1455 = vrot.lane.b32.xlu2 %v4006_v58, %s2236_s11  ;;  %v4027_v58 = vld [vmem:[#allocation48_spill] sm:$0xff]  ;;  %2059 = vmatpush.msra.mxu2 %v1646_v4 }
 0x26a   : > { %1290 = vst.msk [vmem:[#allocation2 + $0x88] sm:$0xff] %vm1272_vm8, %v1211_v37  ;;  %v1213_v46 = vpop.permute.xlu1 %1212  ;;  %v272_v37 = vld [vmem:[%s2319_s30 + $0x1a8] sm:$0x3]  ;;  %1668 = vmatpush.msra.mxu0 %v1645_v42  ;;  %2058 = vmatpush.msra.mxu1 %v1646_v4 }
 0x26b   : > { %1291 = vst.msk [vmem:[#allocation2 + $0x90] sm:$0xff] %vm1272_vm8, %v1213_v46  ;;  %v1314_v47 = vpop.permute.xlu2 %1313  ;;  %v1644_v46 = vld [vmem:[%s3848_s1 + $0x28] sm:$0xff]  ;;  %2062 = vmatpush.msra.mxu2 %v1645_v42  ;;  %2060 = vmatpush.msra.mxu3 %v1646_v4 }
 0x26c   : > { %1409 = vst.msk [vmem:[#allocation2 + $0x8] sm:$0xff] %vm1407_vm9, %v1314_v47  ;;  %v4044_v47 = vld [vmem:[#allocation16_spill] sm:$0xff]  ;;  %1669 = vmatpush.msra.mxu0 %v1644_v46  ;;  %2061 = vmatpush.msra.mxu1 %v1645_v42 }
 0x26d   : > { %2065 = vmatpush.msra.mxu2 %v1644_v46  ;;  %2063 = vmatpush.msra.mxu3 %v1645_v42 }
 0x26e   : > { %2064 = vmatpush.msra.mxu1 %v1644_v46 }
 0x26f   : > { %1465 = vrot.lane.b32.xlu0 %v2822_v49, %s2236_s11  ;;  %2066 = vmatpush.msra.mxu3 %v1644_v46 }
 0x270   : > { %1355 = vrot.lane.b32.xlu1 %v4025_v54, %s2235_s10 }
 0x271   : > { %v1217_v56 = vpop.permute.xlu0 %1216  ;;  %1365 = vrot.lane.b32.xlu2 %v4026_v61, %s2235_s10  ;;  %v1643_v61 = vld [vmem:[%s3848_s1 + $0x20] sm:$0xff] }
 0x272   : > { %1293 = vst.msk [vmem:[#allocation2 + $0xa0] sm:$0xff] %vm1272_vm8, %v1217_v56  ;;  %v1219_v60 = vpop.permute.xlu1 %1218  ;;  %v1309_v56 = vrot.slane %v272_v37, 1  ;;  %1670 = vmatpush.msra.mxu0 %v1643_v61  ;;  %2068 = vmatpush.msra.mxu2 %v1643_v61 }
 0x273   : > { %1294 = vst.msk [vmem:[#allocation2 + $0xa8] sm:$0xff] %vm1272_vm8, %v1219_v60  ;;  %v1482_v15 = vpop.permute.xlu2 %1481  ;;  %2067 = vmatpush.msra.mxu1 %v1643_v61  ;;  %2069 = vmatpush.msra.mxu3 %v1643_v61 }
 0x277   : > { %1489 = vrot.lane.b32.xlu0 %v4027_v58, %s2236_s11 }
 0x278   : > { %1499 = vrot.lane.b32.xlu1 %v2950_v63, %s2236_s11  ;;  %v4029_v63 = vld [vmem:[#allocation13_spill] sm:$0xff] }
 0x279   : > { %v1478_v49 = vpop.permute.xlu0 %1477  ;;  %1323 = vrot.lane.b32.xlu2 %v4028_v39, %s2235_s10  ;;  %v1640_v39 = vld [vmem:[%s3848_s1 + $0x8] sm:$0xff] }
 0x27a   : > { %1558 = vst.msk [vmem:[#allocation2 + $0x80] sm:$0xff] %vm1541_vm10, %v1478_v49  ;;  %v1312_v16 = vpop.permute.xlu1 %1311  ;;  %v1641_v49 = vld [vmem:[%s3848_s1 + $0x10] sm:$0xff] }
 0x27b   : > { %1591 = vst.msk [vmem:[#allocation2 + $0x80] sm:$0xff] %vm1574_vm11, %v2237_v35  ;;  %v1450_v50 = vpop.permute.xlu2 %1449 }
 0x27c   : > { %1408 = vst.msk [vmem:[#allocation2] sm:$0xff] %vm1407_vm9, %v1312_v16  ;;  %v1310_v16 = vsel %vm354_vm0, %v1307_v13, %v1309_v56 }
 0x27d   : > { %1542 = vst.msk [vmem:[#allocation2] sm:$0xff] %vm1541_vm10, %v1446_v36 }
 0x27e   : > { %1575 = vst.msk [vmem:[#allocation2] sm:$0xff] %vm1574_vm11, %v2237_v35 }
 0x27f   : > { %1333 = vrot.lane.b32.xlu0 %v4029_v63, %s2235_s10 }
 0x280   : > { %1222 = vrot.lane.b32.xlu1 %v4030_v51, %s2234_s9  ;;  %v1639_v51 = vld [vmem:[%s3848_s1] sm:$0xff] }
 0x281   : > { %v1346_v26 = vpop.permute.xlu0 %1345  ;;  %1232 = vrot.lane.b32.xlu2 %v3045_v17, %s2234_s9  ;;  %v4034_v17 = vld [vmem:[#allocation10_spill] sm:$0xff] }
 0x282   : > { %1425 = vst.msk [vmem:[#allocation2 + $0x88] sm:$0xff] %vm1407_vm9, %v1346_v26  ;;  %v1480_v27 = vpop.permute.xlu1 %1479  ;;  %v1441_v26 = vrot.slane %v3561_v52, 2 }
 0x283   : > { %1559 = vst.msk [vmem:[#allocation2 + $0x88] sm:$0xff] %vm1541_vm10, %v1480_v27  ;;  %v1484_v19 = vpop.permute.xlu2 %1483  ;;  %v1443_v27 = vrot.slane %v272_v37, 2 }
 0x284   : > { %1592 = vst.msk [vmem:[#allocation2 + $0x88] sm:$0xff] %vm1574_vm11, %v2237_v35 }
 0x287   : > { %1457 = vrot.lane.b32.xlu0 %v4031_v21, %s2236_s11 }
 0x288   : > { %1467 = vrot.lane.b32.xlu1 %v4032_v24, %s2236_s11  ;;  %v1444_v24 = vsel %vm564_vm2, %v1441_v26, %v1443_v27 }
 0x289   : > { %v1448_v45 = vpop.permute.xlu0 %1447  ;;  %1357 = vrot.lane.b32.xlu2 %v4033_v34, %s2235_s10 }
 0x28a   : > { %1543 = vst.msk [vmem:[#allocation2 + $0x8] sm:$0xff] %vm1541_vm10, %v1448_v45  ;;  %v1348_v3 = vpop.permute.xlu1 %1347  ;;  %v1440_v45 = vrot.slane %v3558_v41, 2 }
 0x28b   : > { %1576 = vst.msk [vmem:[#allocation2 + $0x8] sm:$0xff] %vm1574_vm11, %v2237_v35  ;;  %v1328_v29 = vpop.permute.xlu2 %1327 }
 0x28c   : > { %1426 = vst.msk [vmem:[#allocation2 + $0x90] sm:$0xff] %vm1407_vm9, %v1348_v3  ;;  %v1623_v3 = vld [vmem:[#allocation2 + $0x80] sm:$0xff]  ;;  %v1442_v34 = vsel %vm564_vm2, %v1440_v45, %v1441_v26 }
 0x28d   : > { %1560 = vst.msk [vmem:[#allocation2 + $0x90] sm:$0xff] %vm1541_vm10, %v1482_v15  ;;  %v1642_v15 = vld [vmem:[%s3848_s1 + $0x18] sm:$0xff] }
 0x28e   : > { %1593 = vst.msk [vmem:[#allocation2 + $0x90] sm:$0xff] %vm1574_vm11, %v2237_v35  ;;  %1671 = vmatpush.msra.mxu0 %v1642_v15  ;;  %2071 = vmatpush.msra.mxu2 %v1642_v15 }
 0x28f   : > { %1367 = vrot.lane.b32.xlu0 %v4034_v17, %s2235_s10  ;;  %1416 = vst.msk [vmem:[#allocation2 + $0x40] sm:$0xff] %vm1407_vm9, %v1328_v29  ;;  %2070 = vmatpush.msra.mxu1 %v1642_v15  ;;  %v4045_v17 = vld [vmem:[#allocation44_spill] sm:$0xff] }
 0x290   : > { %1491 = vrot.lane.b32.xlu1 %v4035_v38, %s2236_s11  ;;  %1672 = vmatpush.msra.mxu0 %v1641_v49 }
 0x291   : > { %v1316_v44 = vpop.permute.xlu0 %1315  ;;  %1501 = vrot.lane.b32.xlu2 %v3260_v1, %s2236_s11  ;;  %v4038_v1 = vld [vmem:[#allocation50_spill] sm:$0xff]  ;;  %2074 = vmatpush.msra.mxu2 %v1641_v49 }
 0x292   : > { %1410 = vst.msk [vmem:[#allocation2 + $0x10] sm:$0xff] %vm1407_vm9, %v1316_v44  ;;  %v1225_v31 = vpop.permute.xlu1 %1224  ;;  %1673 = vmatpush.msra.mxu0 %v1640_v39  ;;  %2073 = vmatpush.msra.mxu1 %v1641_v49 }
 0x293   : > { %1297 = vst.msk [vmem:[#allocation2 + $0xc0] sm:$0xff] %vm1272_vm8, %v1225_v31  ;;  %v1462_v25 = vpop.permute.xlu2 %1461  ;;  %2077 = vmatpush.msra.mxu2 %v1640_v39  ;;  %2072 = vmatpush.msra.mxu3 %v1642_v15  ;;  %v1608_v31 = vld [vmem:[#allocation2 + $0x8] sm:$0xff] }
 0x294   : > { %1544 = vst.msk [vmem:[#allocation2 + $0x10] sm:$0xff] %vm1541_vm10, %v1450_v50  ;;  %1674 = vmatpush.msra.mxu0 %v1639_v51  ;;  %2076 = vmatpush.msra.mxu1 %v1640_v39 }
 0x295   : > { %1577 = vst.msk [vmem:[#allocation2 + $0x10] sm:$0xff] %vm1574_vm11, %v2237_v35  ;;  %2080 = vmatpush.msra.mxu2 %v1639_v51  ;;  %2075 = vmatpush.msra.mxu3 %v1641_v49 }
 0x296   : > { %1550 = vst.msk [vmem:[#allocation2 + $0x40] sm:$0xff] %vm1541_vm10, %v1462_v25  ;;  %1723 = vmatmul.f32.vlgmr.msra.gmra.mxu2 %v1623_v3  ;;  %2079 = vmatpush.msra.mxu1 %v1639_v51  ;;  %v4046_v25 = vld [vmem:[#allocation43_spill] sm:$0xff] }
 0x297   : > { %1325 = vrot.lane.b32.xlu0 %v4036_v48, %s2235_s10  ;;  %1583 = vst.msk [vmem:[#allocation2 + $0x40] sm:$0xff] %vm1574_vm11, %v2237_v35  ;;  %v1624_v48 = vld [vmem:[#allocation2 + $0x88] sm:$0xff]  ;;  %2078 = vmatpush.msra.mxu3 %v1640_v39 }
 0x298   : > { %1335 = vrot.lane.b32.xlu1 %v4037_v5, %s2235_s10 }
 0x299   : > { %v1350_v14 = vpop.permute.xlu0 %1349  ;;  %1234 = vrot.lane.b32.xlu2 %v4038_v1, %s2234_s9  ;;  %2081 = vmatpush.msra.mxu3 %v1639_v51 }
 0x29a   : > { %1427 = vst.msk [vmem:[#allocation2 + $0x98] sm:$0xff] %vm1407_vm9, %v1350_v14  ;;  %v1360_v2 = vpop.permute.xlu1 %1359 }
 0x29b   : > { %1432 = vst.msk [vmem:[#allocation2 + $0xc0] sm:$0xff] %vm1407_vm9, %v1360_v2  ;;  %v3530_v33 = vpop.permute.xlu2 %1485 }
 0x29c   : > { %1561 = vst.msk [vmem:[#allocation2 + $0x98] sm:$0xff] %vm1541_vm10, %v1484_v19  ;;  %v1607_v19 = vld [vmem:[#allocation2] sm:$0xff]  ;;  %v1609_v1 = vld [vmem:[#allocation2 + $0x10] sm:$0xff] }
 0x29d   : > { %1594 = vst.msk [vmem:[#allocation2 + $0x98] sm:$0xff] %vm1574_vm11, %v2237_v35  ;;  %1675 = vmatmul.f32.vlgmr.msra.gmra.mxu0 %v1607_v19 }
 0x29e   : > { %1726 = vmatmul.f32.gmra.mxu2 %v1624_v48 }
 0x29f   : > { %1459 = vrot.lane.b32.xlu0 %v4039_v8, %s2236_s11  ;;  %v1625_v8 = vld [vmem:[#allocation2 + $0x90] sm:$0xff] }
 0x2a0   : > { %1469 = vrot.lane.b32.xlu1 %v4040_v20, %s2236_s11 }
 0x2a1   : > { %v1494_v11 = vpop.permute.xlu0 %1493  ;;  %1369 = vrot.lane.b32.xlu2 %v4041_v40, %s2235_s10 }
 0x2a2   : > { %1566 = vst.msk [vmem:[#allocation2 + $0xc0] sm:$0xff] %vm1541_vm10, %v1494_v11  ;;  %v1318_v9 = vpop.permute.xlu1 %1317 }
 0x2a3   : > { %1599 = vst.msk [vmem:[#allocation2 + $0xc0] sm:$0xff] %vm1574_vm11, %v2237_v35  ;;  %v1330_v62 = vpop.permute.xlu2 %1329 }
 0x2a4   : > { %1411 = vst.msk [vmem:[#allocation2 + $0x18] sm:$0xff] %vm1407_vm9, %v1318_v9  ;;  %v1626_v55 = vld [vmem:[#allocation2 + $0x98] sm:$0xff] }
 0x2a5   : > { %1417 = vst.msk [vmem:[#allocation2 + $0x48] sm:$0xff] %vm1407_vm9, %v1330_v62  ;;  %1678 = vmatmul.f32.gmra.mxu0 %v1608_v31 }
 0x2a6   : > { %1729 = vmatmul.f32.gmra.mxu2 %v1625_v8 }
 0x2a7   : > { %1503 = vrot.lane.b32.xlu0 %v3265_v57, %s2236_s11 }
 0x2a8   : > { %1337 = vrot.lane.b32.xlu1 %v4042_v53, %s2235_s10 }
 0x2a9   : > { %v1227_v18 = vpop.permute.xlu0 %1226  ;;  %1236 = vrot.lane.b32.xlu2 %v3558_v41, %s2234_s9 }
 0x2aa   : > { %1298 = vst.msk [vmem:[#allocation2 + $0xc8] sm:$0xff] %vm1272_vm8, %v1227_v18  ;;  %v1452_v57 = vpop.permute.xlu1 %1451 }
 0x2ab   : > { %1545 = vst.msk [vmem:[#allocation2 + $0x18] sm:$0xff] %vm1541_vm10, %v1452_v57  ;;  %v1464_v7 = vpop.permute.xlu2 %1463 }
 0x2ac   : > { %1578 = vst.msk [vmem:[#allocation2 + $0x18] sm:$0xff] %vm1574_vm11, %v2237_v35 }
 0x2ad   : > { %1551 = vst.msk [vmem:[#allocation2 + $0x48] sm:$0xff] %vm1541_vm10, %v1464_v7  ;;  %1681 = vmatmul.f32.gmra.mxu0 %v1609_v1  ;;  %v1615_v7 = vld [vmem:[#allocation2 + $0x40] sm:$0xff] }
 0x2ae   : > { %1584 = vst.msk [vmem:[#allocation2 + $0x48] sm:$0xff] %vm1574_vm11, %v2237_v35  ;;  %1732 = vmatmul.f32.gmra.mxu2 %v1626_v55  ;;  %1699 = vmatmul.f32.vlgmr.msra.gmra.mxu1 %v1615_v7 }
 0x2af   : > { %1471 = vrot.lane.b32.xlu0 %v4043_v23, %s2236_s11 }
 0x2b0   : > { %1371 = vrot.lane.b32.xlu1 %v1308_v6, %s2235_s10 }
 0x2b1   : > { %v1352_v30 = vpop.permute.xlu0 %1351  ;;  %1505 = vrot.lane.b32.xlu2 %v1442_v34, %s2236_s11 }
 0x2b2   : > { %1428 = vst.msk [vmem:[#allocation2 + $0xa0] sm:$0xff] %vm1407_vm9, %v1352_v30  ;;  %v1362_v36 = vpop.permute.xlu1 %1361  ;;  %v1631_v30 = vld [vmem:[#allocation2 + $0xc0] sm:$0xff] }
 0x2b3   : > { %1433 = vst.msk [vmem:[#allocation2 + $0xc8] sm:$0xff] %vm1407_vm9, %v1362_v36  ;;  %v3610_v54 = vpop.permute.xlu2 %1487  ;;  %v1610_v59 = vld [vmem:[#allocation2 + $0x18] sm:$0xff]  ;;  %1747 = vmatmul.f32.vlgmr.msra.gmra.mxu3 %v1631_v30 }
 0x2b4   : > { %1562 = vst.msk [vmem:[#allocation2 + $0xa0] sm:$0xff] %vm1541_vm10, %v3530_v33  ;;  %v4047_v33 = vld [vmem:[#allocation17_spill] sm:$0xff] }
 0x2b5   : > { %1595 = vst.msk [vmem:[#allocation2 + $0xa0] sm:$0xff] %vm1574_vm11, %v2237_v35  ;;  %1684 = vmatmul.f32.gmra.mxu0 %v1610_v59  ;;  %v1616_v36 = vld [vmem:[#allocation2 + $0x48] sm:$0xff] }
 0x2b6   : > { %1702 = vmatmul.f32.gmra.mxu1 %v1616_v36 }
 0x2b7   : > { %1339 = vrot.lane.b32.xlu0 %v4044_v47, %s2235_s10 }
 0x2b8   : > { %1238 = vrot.lane.b32.xlu1 %v3561_v52, %s2234_s9  ;;  %s1918_s9 = sshll.u32 %s1915_s8, 4  ;;  %s1919_s9 = int_to_ptr.hbm [resolvable:$true] %s1918_s9 }
 0x2b9   : > { %v1496_v60 = vpop.permute.xlu0 %1495  ;;  %1473 = vrot.lane.b32.xlu2 %v4046_v25, %s2236_s11  ;;  %s2163_s21 = sshra.s32 %s1919_s9, 4  ;;  %s2164_s21 = int_to_ptr.hbm [resolvable:$true] %s2163_s21 }
 0x2ba   : > { %1567 = vst.msk [vmem:[#allocation2 + $0xc8] sm:$0xff] %vm1541_vm10, %v1496_v60  ;;  %v1320_v58 = vpop.permute.xlu1 %1319  ;;  %s2165_s23 = scalar_lea.hbm %s2164_s21, 256  ;;  %p2170_p1 = scmp.lt.s32.totalorder %s2164_s21, %s3850_s3 }
 0x2bb   : > { %1600 = vst.msk [vmem:[#allocation2 + $0xc8] sm:$0xff] %vm1574_vm11, %v2237_v35  ;;  %v1332_v63 = vpop.permute.xlu2 %1331  ;;  %p2166_p12 = scmp.ne.s32.totalorder %s2164_s21, %s2165_s23  ;;  %p2171_p2 = scmp.lt.s32.totalorder %s2169_s27, %s2165_s23 }
 0x2bc   : > { %1412 = vst.msk [vmem:[#allocation2 + $0x20] sm:$0xff] %vm1407_vm9, %v1320_v58  ;;  %v1627_v18 = vld [vmem:[#allocation2 + $0xa0] sm:$0xff] }
 0x2bd   : > { %1418 = vst.msk [vmem:[#allocation2 + $0x50] sm:$0xff] %vm1407_vm9, %v1332_v63  ;;  %1735 = vmatmul.f32.gmra.mxu2 %v1627_v18  ;;  %p2167_p13 = pnand %p2166_p12, %p2299_p4  ;;  %p2172_p3 = por %p2171_p2, %p2170_p1 }
 0x2bf   : > { %1373 = vrot.lane.b32.xlu0 %v1310_v16, %s2235_s10  ;;  %p2168_p0 = pneg %p2167_p13 }
 0x2c0   : > { %1507 = vrot.lane.b32.xlu1 %v1444_v24, %s2236_s11 }
 0x2c1   : > { %v1229_v50 = vpop.permute.xlu0 %1228  ;;  %1341 = vrot.lane.b32.xlu2 %v4047_v33, %s2235_s10  ;;  %p2173_p5 = pnand %p2172_p3, %p2168_p0 }
 0x2c2   : > { %1299 = vst.msk [vmem:[#allocation2 + $0xd0] sm:$0xff] %vm1272_vm8, %v1229_v50  ;;  %v1454_v21 = vpop.permute.xlu1 %1453  ;;  %v1632_v4 = vld [vmem:[#allocation2 + $0xc8] sm:$0xff] }
 0x2c3   : > { %1546 = vst.msk [vmem:[#allocation2 + $0x20] sm:$0xff] %vm1541_vm10, %v1454_v21  ;;  %v1456_v29 = vpop.permute.xlu2 %1455  ;;  %1750 = vmatmul.f32.gmra.mxu3 %v1632_v4 }
 0x2c4   : > { %1579 = vst.msk [vmem:[#allocation2 + $0x20] sm:$0xff] %vm1574_vm11, %v2237_v35 }
 0x2c7   : > { %1475 = vrot.lane.b32.xlu0 %v4045_v17, %s2236_s11 }
 0x2c9   : > { %v1354_v38 = vpop.permute.xlu0 %1353 }
 0x2ca   : > { %1429 = vst.msk [vmem:[#allocation2 + $0xa8] sm:$0xff] %vm1407_vm9, %v1354_v38  ;;  %v1364_v44 = vpop.permute.xlu1 %1363 }
 0x2cb   : > { %1434 = vst.msk [vmem:[#allocation2 + $0xd0] sm:$0xff] %vm1407_vm9, %v1364_v44  ;;  %v1366_v5 = vpop.permute.xlu2 %1365  ;;  %v1611_v53 = vld [vmem:[#allocation2 + $0x20] sm:$0xff] }
 0x2cc   : > { %1563 = vst.msk [vmem:[#allocation2 + $0xa8] sm:$0xff] %vm1541_vm10, %v3610_v54  ;;  %1687 = vmatmul.f32.gmra.mxu0 %v1611_v53 }
 0x2cd   : > { %1596 = vst.msk [vmem:[#allocation2 + $0xa8] sm:$0xff] %vm1574_vm11, %v2237_v35 }
 0x2d1   : > { %v1498_v14 = vpop.permute.xlu0 %1497 }
 0x2d2   : > { %1568 = vst.msk [vmem:[#allocation2 + $0xd0] sm:$0xff] %vm1541_vm10, %v1498_v14  ;;  %v1322_v2 = vpop.permute.xlu1 %1321 }
 0x2d3   : > { %1601 = vst.msk [vmem:[#allocation2 + $0xd0] sm:$0xff] %vm1574_vm11, %v2237_v35  ;;  %v1324_v20 = vpop.permute.xlu2 %1323 }
 0x2d4   : > { %1413 = vst.msk [vmem:[#allocation2 + $0x28] sm:$0xff] %vm1407_vm9, %v1322_v2  ;;  %v1628_v57 = vld [vmem:[#allocation2 + $0xa8] sm:$0xff]  ;;  %v3736_v2 = vld [vmem:[%s3849_s2] ss:$0 sm:$0xff] }
 0x2d5   : > { %1547 = vst.msk [vmem:[#allocation2 + $0x28] sm:$0xff] %vm1541_vm10, %v1456_v29  ;;  %1738 = vmatmul.f32.gmra.mxu2 %v1628_v57 }
 0x2d6   : > { %1580 = vst.msk [vmem:[#allocation2 + $0x28] sm:$0xff] %vm1574_vm11, %v2237_v35 }
 0x2d7   : > { %1414 = vst.msk [vmem:[#allocation2 + $0x30] sm:$0xff] %vm1407_vm9, %v1324_v20 }
 0x2d9   : > { %v1221_v11 = vpop.permute.xlu0 %1220 }
 0x2da   : > { %1295 = vst.msk [vmem:[#allocation2 + $0xb0] sm:$0xff] %vm1272_vm8, %v1221_v11  ;;  %v1231_v9 = vpop.permute.xlu1 %1230  ;;  %v1633_v60 = vld [vmem:[#allocation2 + $0xd0] sm:$0xff] }
 0x2db   : > { %1300 = vst.msk [vmem:[#allocation2 + $0xd8] sm:$0xff] %vm1272_vm8, %v1231_v9  ;;  %v1233_v10 = vpop.permute.xlu2 %1232  ;;  %1753 = vmatmul.f32.gmra.mxu3 %v1633_v60 }
 0x2dc   : > { %1435 = vst.msk [vmem:[#allocation2 + $0xd8] sm:$0xff] %vm1407_vm9, %v1366_v5 }
 0x2dd   : > { %1301 = vst.msk [vmem:[#allocation2 + $0xe0] sm:$0xff] %vm1272_vm8, %v1233_v10  ;;  %v1612_v52 = vld [vmem:[#allocation2 + $0x28] sm:$0xff] }
 0x2de   : > { %1690 = vmatmul.f32.gmra.mxu0 %v1612_v52 }
 0x2e1   : > { %v1466_v40 = vpop.permute.xlu0 %1465 }
 0x2e2   : > { %1552 = vst.msk [vmem:[#allocation2 + $0x50] sm:$0xff] %vm1541_vm10, %v1466_v40  ;;  %v1356_v62 = vpop.permute.xlu1 %1355 }
 0x2e3   : > { %1585 = vst.msk [vmem:[#allocation2 + $0x50] sm:$0xff] %vm1574_vm11, %v2237_v35  ;;  %v1358_v13 = vpop.permute.xlu2 %1357 }
 0x2e4   : > { %1430 = vst.msk [vmem:[#allocation2 + $0xb0] sm:$0xff] %vm1407_vm9, %v1356_v62 }
 0x2e9   : > { %v1490_v28 = vpop.permute.xlu0 %1489 }
 0x2ea   : > { %1564 = vst.msk [vmem:[#allocation2 + $0xb0] sm:$0xff] %vm1541_vm10, %v1490_v28  ;;  %v1500_v41 = vpop.permute.xlu1 %1499  ;;  %v1617_v54 = vld [vmem:[#allocation2 + $0x50] sm:$0xff] }
 0x2eb   : > { %1597 = vst.msk [vmem:[#allocation2 + $0xb0] sm:$0xff] %vm1574_vm11, %v2237_v35  ;;  %v1502_v23 = vpop.permute.xlu2 %1501  ;;  %1705 = vmatmul.f32.gmra.mxu1 %v1617_v54 }
 0x2ec   : > { %1569 = vst.msk [vmem:[#allocation2 + $0xd8] sm:$0xff] %vm1541_vm10, %v1500_v41 }
 0x2ed   : > { %1602 = vst.msk [vmem:[#allocation2 + $0xd8] sm:$0xff] %vm1574_vm11, %v2237_v35 }
 0x2f1   : > { %v1334_v12 = vpop.permute.xlu0 %1333 }
 0x2f2   : > { %1419 = vst.msk [vmem:[#allocation2 + $0x58] sm:$0xff] %vm1407_vm9, %v1334_v12  ;;  %v1223_v0 = vpop.permute.xlu1 %1222  ;;  %v1629_v22 = vld [vmem:[#allocation2 + $0xb0] sm:$0xff] }
 0x2f3   : > { %1296 = vst.msk [vmem:[#allocation2 + $0xb8] sm:$0xff] %vm1272_vm8, %v1223_v0  ;;  %1741 = vmatmul.f32.gmra.mxu2 %v1629_v22  ;;  %v1235_v46 = vpop.permute.xlu2 %1234 }
 0x2f4   : > { %1431 = vst.msk [vmem:[#allocation2 + $0xb8] sm:$0xff] %vm1407_vm9, %v1358_v13  ;;  %v1634_v39 = vld [vmem:[#allocation2 + $0xd8] sm:$0xff] }
 0x2f5   : > { %1302 = vst.msk [vmem:[#allocation2 + $0xe8] sm:$0xff] %vm1272_vm8, %v1235_v46  ;;  %1756 = vmatmul.f32.gmra.mxu3 %v1634_v39 }
 0x2f9   : > { %v1458_v6 = vpop.permute.xlu0 %1457 }
 0x2fa   : > { %1548 = vst.msk [vmem:[#allocation2 + $0x30] sm:$0xff] %vm1541_vm10, %v1458_v6  ;;  %v1468_v43 = vpop.permute.xlu1 %1467 }
 0x2fb   : > { %1581 = vst.msk [vmem:[#allocation2 + $0x30] sm:$0xff] %vm1574_vm11, %v2237_v35  ;;  %v1370_v58 = vpop.permute.xlu2 %1369 }
 0x2fc   : > { %1553 = vst.msk [vmem:[#allocation2 + $0x58] sm:$0xff] %vm1541_vm10, %v1468_v43 }
 0x2fd   : > { %1586 = vst.msk [vmem:[#allocation2 + $0x58] sm:$0xff] %vm1574_vm11, %v2237_v35 }
 0x2fe   : > { %1437 = vst.msk [vmem:[#allocation2 + $0xe8] sm:$0xff] %vm1407_vm9, %v1370_v58 }
 0x301   : > { %v1368_v32 = vpop.permute.xlu0 %1367 }
 0x302   : > { %1436 = vst.msk [vmem:[#allocation2 + $0xe0] sm:$0xff] %vm1407_vm9, %v1368_v32  ;;  %v1613_v42 = vld [vmem:[#allocation2 + $0x30] sm:$0xff]  ;;  %v1492_v37 = vpop.permute.xlu1 %1491 }
 0x303   : > { %1693 = vmatmul.f32.gmra.mxu0 %v1613_v42  ;;  %1565 = vst.msk [vmem:[#allocation2 + $0xb8] sm:$0xff] %vm1541_vm10, %v1492_v37  ;;  %v1237_v63 = vpop.permute.xlu2 %1236 }
 0x304   : > { %1598 = vst.msk [vmem:[#allocation2 + $0xb8] sm:$0xff] %vm1574_vm11, %v2237_v35  ;;  %v1618_v49 = vld [vmem:[#allocation2 + $0x58] sm:$0xff] }
 0x305   : > { %1570 = vst.msk [vmem:[#allocation2 + $0xe0] sm:$0xff] %vm1541_vm10, %v1502_v23  ;;  %1708 = vmatmul.f32.gmra.mxu1 %v1618_v49 }
 0x306   : > { %1603 = vst.msk [vmem:[#allocation2 + $0xe0] sm:$0xff] %vm1574_vm11, %v2237_v35 }
 0x307   : > { %1303 = vst.msk [vmem:[#allocation2 + $0xf0] sm:$0xff] %vm1272_vm8, %v1237_v63 }
 0x309   : > { %v1326_v47 = vpop.permute.xlu0 %1325 }
 0x30a   : > { %1415 = vst.msk [vmem:[#allocation2 + $0x38] sm:$0xff] %vm1407_vm9, %v1326_v47  ;;  %v1336_v56 = vpop.permute.xlu1 %1335 }
 0x30b   : > { %v1630_v61 = vld [vmem:[#allocation2 + $0xb8] sm:$0xff]  ;;  %1420 = vst.msk [vmem:[#allocation2 + $0x60] sm:$0xff] %vm1407_vm9, %v1336_v56  ;;  %v1506_v19 = vpop.permute.xlu2 %1505 }
 0x30c   : > { %1744 = vmatmul.f32.gmra.mxu2 %v1630_v61 }
 0x30d   : > { %v1635_v27 = vld [vmem:[#allocation2 + $0xe0] sm:$0xff] }
 0x30e   : > { %1759 = vmatmul.f32.gmra.mxu3 %v1635_v27 }
 0x311   : > { %v1460_v15 = vpop.permute.xlu0 %1459 }
 0x312   : > { %1549 = vst.msk [vmem:[#allocation2 + $0x38] sm:$0xff] %vm1541_vm10, %v1460_v15  ;;  %v1470_v16 = vpop.permute.xlu1 %1469 }
 0x313   : > { %1582 = vst.msk [vmem:[#allocation2 + $0x38] sm:$0xff] %vm1574_vm11, %v2237_v35  ;;  %v1474_v34 = vpop.permute.xlu2 %1473 }
 0x314   : > { %1554 = vst.msk [vmem:[#allocation2 + $0x60] sm:$0xff] %vm1541_vm10, %v1470_v16 }
 0x315   : > { %1587 = vst.msk [vmem:[#allocation2 + $0x60] sm:$0xff] %vm1574_vm11, %v2237_v35 }
 0x319   : > { %v1504_v50 = vpop.permute.xlu0 %1503  ;;  %v1724_v59 = vpop.f32.mrf.mxu2 }
 0x31a   : > { %v1614_v51 = vld [vmem:[#allocation2 + $0x38] sm:$0xff]  ;;  %1571 = vst.msk [vmem:[#allocation2 + $0xe8] sm:$0xff] %vm1541_vm10, %v1504_v50  ;;  %v1338_v26 = vpop.permute.xlu1 %1337  ;;  %v1676_v8 = vpop.f32.mrf.mxu0 }
 0x31b   : > { %1696 = vmatmul.f32.gmra.mxu0 %v1614_v51  ;;  %1604 = vst.msk [vmem:[#allocation2 + $0xe8] sm:$0xff] %vm1574_vm11, %v2237_v35  ;;  %v1342_v31 = vpop.permute.xlu2 %1341  ;;  %v1677_v33 = vadd.f32 %v3736_v2, %v1676_v8 }
 0x31c   : > { %1421 = vst.msk [vmem:[#allocation2 + $0x68] sm:$0xff] %vm1407_vm9, %v1338_v26  ;;  %v1619_v21 = vld [vmem:[#allocation2 + $0x60] sm:$0xff] }
 0x31d   : > { %1711 = vmatmul.f32.gmra.mxu1 %v1619_v21  ;;  %1423 = vst.msk [vmem:[#allocation2 + $0x78] sm:$0xff] %vm1407_vm9, %v1342_v31  ;;  %v1772_v11 = vmax.f32 %v1677_v33, 0.0 }
 0x31f   : > { %1804 = vxpose.xlu1.b32.start [1/16] %v1772_v11, 128 }
 0x321   : > { %v1472_v24 = vpop.permute.xlu0 %1471  ;;  %v1727_v53 = vpop.f32.mrf.mxu2 }
 0x322   : > { %1555 = vst.msk [vmem:[#allocation2 + $0x68] sm:$0xff] %vm1541_vm10, %v1472_v24  ;;  %v1372_v45 = vpop.permute.xlu1 %1371  ;;  %v1636_v3 = vld [vmem:[#allocation2 + $0xe8] sm:$0xff]  ;;  %v1679_v9 = vpop.f32.mrf.mxu0  ;;  %v1728_v28 = vadd.f32 %v3736_v2, %v1727_v53 }
 0x323   : > { %1588 = vst.msk [vmem:[#allocation2 + $0x68] sm:$0xff] %vm1574_vm11, %v2237_v35  ;;  %1762 = vmatmul.f32.gmra.mxu3 %v1636_v3  ;;  %v1680_v55 = vadd.f32 %v3736_v2, %v1679_v9 }
 0x324   : > { %1438 = vst.msk [vmem:[#allocation2 + $0xf0] sm:$0xff] %vm1407_vm9, %v1372_v45  ;;  %v1789_v52 = vmax.f32 %v1728_v28, 0.0 }
 0x325   : > { %1572 = vst.msk [vmem:[#allocation2 + $0xf0] sm:$0xff] %vm1541_vm10, %v1506_v19  ;;  %v1773_v10 = vmax.f32 %v1680_v55, 0.0 }
 0x326   : > { %1605 = vst.msk [vmem:[#allocation2 + $0xf0] sm:$0xff] %vm1574_vm11, %v2237_v35 }
 0x327   : > { %1805 = vxpose.xlu1.b32.cont [2/16] %v1773_v10, 128 }
 0x329   : > { %v1340_v17 = vpop.permute.xlu0 %1339  ;;  %v1730_v12 = vpop.f32.mrf.mxu2 }
 0x32a   : > { %1422 = vst.msk [vmem:[#allocation2 + $0x70] sm:$0xff] %vm1407_vm9, %v1340_v17  ;;  %v1239_v29 = vpop.permute.xlu1 %1238  ;;  %v1620_v38 = vld [vmem:[#allocation2 + $0x68] sm:$0xff]  ;;  %v1682_v62 = vpop.f32.mrf.mxu0  ;;  %v1731_v13 = vadd.f32 %v3736_v2, %v1730_v12 }
 0x32b   : > { %1304 = vst.msk [vmem:[#allocation2 + $0xf8] sm:$0xff] %vm1272_vm8, %v1239_v29  ;;  %1714 = vmatmul.f32.gmra.mxu1 %v1620_v38  ;;  %v1683_v18 = vadd.f32 %v3736_v2, %v1682_v62  ;;  %v1700_v51 = vpop.f32.mrf.mxu1 }
 0x32c   : > { %1556 = vst.msk [vmem:[#allocation2 + $0x70] sm:$0xff] %vm1541_vm10, %v1474_v34  ;;  %v1790_v6 = vmax.f32 %v1731_v13, 0.0  ;;  %v1701_v31 = vadd.f32 %v3736_v2, %v1700_v51 }
 0x32d   : > { %1589 = vst.msk [vmem:[#allocation2 + $0x70] sm:$0xff] %vm1574_vm11, %v2237_v35  ;;  %v1637_v44 = vld [vmem:[#allocation2 + $0xf0] sm:$0xff]  ;;  %v1774_v41 = vmax.f32 %v1683_v18, 0.0 }
 0x32e   : > { %1765 = vmatmul.f32.gmra.mxu3 %v1637_v44 }
 0x32f   : > { %1806 = vxpose.xlu1.b32.cont [3/16] %v1774_v41, 128 }
 0x331   : > { %v1374_v48 = vpop.permute.xlu0 %1373  ;;  %v1733_v23 = vpop.f32.mrf.mxu2 }
 0x332   : > { %1439 = vst.msk [vmem:[#allocation2 + $0xf8] sm:$0xff] %vm1407_vm9, %v1374_v48  ;;  %v1508_v5 = vpop.permute.xlu1 %1507  ;;  %v1685_v57 = vpop.f32.mrf.mxu0  ;;  %v1734_v30 = vadd.f32 %v3736_v2, %v1733_v23 }
 0x333   : > { %1573 = vst.msk [vmem:[#allocation2 + $0xf8] sm:$0xff] %vm1541_vm10, %v1508_v5  ;;  %v1686_v0 = vadd.f32 %v3736_v2, %v1685_v57  ;;  %v1703_v45 = vpop.f32.mrf.mxu1  ;;  %v1780_v5 = vmax.f32 %v1701_v31, 0.0 }
 0x334   : > { %v1621_v25 = vld [vmem:[#allocation2 + $0x70] sm:$0xff]  ;;  %1606 = vst.msk [vmem:[#allocation2 + $0xf8] sm:$0xff] %vm1574_vm11, %v2237_v35  ;;  %v1791_v36 = vmax.f32 %v1734_v30, 0.0  ;;  %v1704_v8 = vadd.f32 %v3736_v2, %v1703_v45 }
 0x335   : > { %1717 = vmatmul.f32.gmra.mxu1 %v1621_v25  ;;  %v1775_v22 = vmax.f32 %v1686_v0, 0.0 }
 0x336   : > { %v1748_v50 = vpop.f32.mrf.mxu3 }
 0x337   : > { %1807 = vxpose.xlu1.b32.cont [4/16] %v1775_v22, 128  ;;  %v1749_v24 = vadd.f32 %v3736_v2, %v1748_v50 }
 0x339   : > { %v1476_v14 = vpop.permute.xlu0 %1475  ;;  %v1796_v17 = vmax.f32 %v1749_v24, 0.0 }
 0x33a   : > { %1557 = vst.msk [vmem:[#allocation2 + $0x78] sm:$0xff] %vm1541_vm10, %v1476_v14 }
 0x33b   : > { %1590 = vst.msk [vmem:[#allocation2 + $0x78] sm:$0xff] %vm1574_vm11, %v2237_v35  ;;  %v1638_v1 = vld [vmem:[#allocation2 + $0xf8] sm:$0xff]  ;;  %v1725_v35 = vadd.f32 %v3736_v2, %v1724_v59 }
 0x33c   : > { %1768 = vmatmul.f32.gmra.mxu3 %v1638_v1 }
 0x33d   : > { %v1788_v40 = vmax.f32 %v1725_v35, 0.0 }
 0x33f   : > { %1836 = vxpose.xlu2.b32.start [1/16] %v1788_v40, 128 }
 0x340   : > { %v1736_v42 = vpop.f32.mrf.mxu2 }
 0x341   : > { %v1737_v46 = vadd.f32 %v3736_v2, %v1736_v42 }
 0x342   : > { %v1622_v20 = vld [vmem:[#allocation2 + $0x78] sm:$0xff] }
 0x343   : > { %1720 = vmatmul.f32.gmra.mxu1 %v1622_v20  ;;  %v1792_v54 = vmax.f32 %v1737_v46, 0.0  ;;  %v1781_v20 = vmax.f32 %v1704_v8, 0.0 }
 0x346   : > { %v1751_v26 = vpop.f32.mrf.mxu3 }
 0x347   : > { %1837 = vxpose.xlu2.b32.cont [2/16] %v1789_v52, 128  ;;  %v1752_v44 = vadd.f32 %v3736_v2, %v1751_v26 }
 0x349   : > { %v1688_v43 = vpop.f32.mrf.mxu0  ;;  %v1797_v25 = vmax.f32 %v1752_v44, 0.0 }
 0x34a   : > { %v1689_v7 = vadd.f32 %v3736_v2, %v1688_v43 }
 0x34c   : > { %v1776_v32 = vmax.f32 %v1689_v7, 0.0 }
 0x34e   : > { %1808 = vxpose.xlu1.b32.cont [5/16] %v1776_v32, 128 }
 0x34f   : > { %1838 = vxpose.xlu2.b32.cont [3/16] %v1790_v6, 128 }
 0x357   : > { %1839 = vxpose.xlu2.b32.cont [4/16] %v1791_v36, 128 }
 0x358   : > { %v1739_v56 = vpop.f32.mrf.mxu2 }
 0x359   : > { %v1740_v60 = vadd.f32 %v3736_v2, %v1739_v56 }
 0x35b   : > { %v1691_v4 = vpop.f32.mrf.mxu0  ;;  %v1793_v61 = vmax.f32 %v1740_v60, 0.0 }
 0x35c   : > { %v1692_v37 = vadd.f32 %v3736_v2, %v1691_v4 }
 0x35e   : > { %v1777_v47 = vmax.f32 %v1692_v37, 0.0  ;;  %v1754_v3 = vpop.f32.mrf.mxu3 }
 0x35f   : > { %1840 = vxpose.xlu2.b32.cont [5/16] %v1792_v54, 128  ;;  %v1755_v1 = vadd.f32 %v3736_v2, %v1754_v3 }
 0x360   : > { %1809 = vxpose.xlu1.b32.cont [6/16] %v1777_v47, 128 }
 0x361   : > { %v1798_v33 = vmax.f32 %v1755_v1, 0.0 }
 0x367   : > { %1841 = vxpose.xlu2.b32.cont [6/16] %v1793_v61, 128 }
 0x368   : > { %v1706_v48 = vpop.f32.mrf.mxu1 }
 0x369   : > { %v1707_v55 = vadd.f32 %v3736_v2, %v1706_v48 }
 0x36b   : > { %v1782_v10 = vmax.f32 %v1707_v55, 0.0 }
 0x376   : > { %v1742_v58 = vpop.f32.mrf.mxu2 }
 0x377   : > { %v1743_v15 = vadd.f32 %v3736_v2, %v1742_v58 }
 0x378   : > { %v1757_v14 = vpop.f32.mrf.mxu3 }
 0x379   : > { %v1794_v49 = vmax.f32 %v1743_v15, 0.0  ;;  %v1758_v59 = vadd.f32 %v3736_v2, %v1757_v14 }
 0x37b   : > { %1842 = vxpose.xlu2.b32.cont [7/16] %v1794_v49, 128  ;;  %v1799_v35 = vmax.f32 %v1758_v59, 0.0 }
 0x380   : > { %v1694_v16 = vpop.f32.mrf.mxu0 }
 0x381   : > { %v1695_v39 = vadd.f32 %v3736_v2, %v1694_v16 }
 0x382   : > { %v1709_v11 = vpop.f32.mrf.mxu1 }
 0x383   : > { %v1778_v63 = vmax.f32 %v1695_v39, 0.0  ;;  %v1710_v53 = vadd.f32 %v3736_v2, %v1709_v11 }
 0x385   : > { %1810 = vxpose.xlu1.b32.cont [7/16] %v1778_v63, 128  ;;  %v1783_v41 = vmax.f32 %v1710_v53, 0.0 }
 0x38f   : > { %v1745_v27 = vpop.f32.mrf.mxu2 }
 0x390   : > { %v1746_v21 = vadd.f32 %v3736_v2, %v1745_v27 }
 0x391   : > { %v1760_v9 = vpop.f32.mrf.mxu3 }
 0x392   : > { %v1795_v19 = vmax.f32 %v1746_v21, 0.0  ;;  %v1761_v62 = vadd.f32 %v3736_v2, %v1760_v9 }
 0x394   : > { %1843 = vxpose.xlu2.b32.cont [8/16] %v1795_v19, 128  ;;  %v1800_v28 = vmax.f32 %v1761_v62, 0.0 }
 0x398   : > { %v1697_v34 = vpop.f32.mrf.mxu0 }
 0x399   : > { %v1698_v29 = vadd.f32 %v3736_v2, %v1697_v34 }
 0x39a   : > { %v1712_v40 = vpop.f32.mrf.mxu1 }
 0x39b   : > { %v1779_v38 = vmax.f32 %v1698_v29, 0.0  ;;  %v1713_v57 = vadd.f32 %v3736_v2, %v1712_v40 }
 0x39c   : > { %1844 = vxpose.xlu2.b32.cont [9/16] %v1796_v17, 128 }
 0x39d   : > { %1811 = vxpose.xlu1.b32.cont [8/16] %v1779_v38, 128  ;;  %v1784_v22 = vmax.f32 %v1713_v57, 0.0 }
 0x3a4   : > { %1845 = vxpose.xlu2.b32.cont [10/16] %v1797_v25, 128 }
 0x3a5   : > { %1812 = vxpose.xlu1.b32.cont [9/16] %v1780_v5, 128 }
 0x3a6   : > { %v1763_v18 = vpop.f32.mrf.mxu3 }
 0x3a7   : > { %v1764_v52 = vadd.f32 %v3736_v2, %v1763_v18 }
 0x3a8   : > { %v1715_v12 = vpop.f32.mrf.mxu1 }
 0x3a9   : > { %v1801_v13 = vmax.f32 %v1764_v52, 0.0  ;;  %v1716_v43 = vadd.f32 %v3736_v2, %v1715_v12 }
 0x3ab   : > { %v1785_v30 = vmax.f32 %v1716_v43, 0.0 }
 0x3ac   : > { %1846 = vxpose.xlu2.b32.cont [11/16] %v1798_v33, 128 }
 0x3ad   : > { %1813 = vxpose.xlu1.b32.cont [10/16] %v1781_v20, 128 }
 0x3b1   : > { %v1766_v0 = vpop.f32.mrf.mxu3 }
 0x3b2   : > { %v1767_v6 = vadd.f32 %v3736_v2, %v1766_v0  ;;  %v1718_v23 = vpop.f32.mrf.mxu1 }
 0x3b3   : > { %v1719_v4 = vadd.f32 %v3736_v2, %v1718_v23 }
 0x3b4   : > { %1847 = vxpose.xlu2.b32.cont [12/16] %v1799_v35, 128  ;;  %v1802_v7 = vmax.f32 %v1767_v6, 0.0 }
 0x3b5   : > { %1814 = vxpose.xlu1.b32.cont [11/16] %v1782_v10, 128  ;;  %v1786_v37 = vmax.f32 %v1719_v4, 0.0 }
 0x3bc   : > { %1848 = vxpose.xlu2.b32.cont [13/16] %v1800_v28, 128 }
 0x3bd   : > { %1815 = vxpose.xlu1.b32.cont [12/16] %v1783_v41, 128 }
 0x3bf   : > { %v1769_v32 = vpop.f32.mrf.mxu3 }
 0x3c0   : > { %v1770_v36 = vadd.f32 %v3736_v2, %v1769_v32  ;;  %v1721_v46 = vpop.f32.mrf.mxu1 }
 0x3c1   : > { %v1722_v47 = vadd.f32 %v3736_v2, %v1721_v46 }
 0x3c2   : > { %v1803_v42 = vmax.f32 %v1770_v36, 0.0 }
 0x3c3   : > { %v1787_v54 = vmax.f32 %v1722_v47, 0.0 }
 0x3c4   : > { %1849 = vxpose.xlu2.b32.cont [14/16] %v1801_v13, 128 }
 0x3c5   : > { %1816 = vxpose.xlu1.b32.cont [13/16] %v1784_v22, 128 }
 0x3cc   : > { %1850 = vxpose.xlu2.b32.cont [15/16] %v1802_v7, 128 }
 0x3cd   : > { %1817 = vxpose.xlu1.b32.cont [14/16] %v1785_v30, 128 }
 0x3d4   : > { %1851 = vxpose.xlu2.b32.end [16/16] %v1803_v42, 128 }
 0x3d5   : > { %1818 = vxpose.xlu1.b32.cont [15/16] %v1786_v37, 128 }
 0x3dd   : > { %1819 = vxpose.xlu1.b32.end [16/16] %v1787_v54, 128 }
 0x3f5   : > { %v1852_v56 = vpop.trf.xlu2 }
 0x3f6   : > { %1869 = vst [vmem:[%s3773_s4 + $0x8] sm:$0xff] %v1852_v56 }
 0x3fd   : > { %v1853_v60 = vpop.trf.xlu2 }
 0x3fe   : > { %1871 = vst [vmem:[%s3773_s4 + $0x18] sm:$0xff] %v1853_v60 }
 0x405   : > { %v1854_v2 = vpop.trf.xlu2 }
 0x406   : > { %1873 = vst [vmem:[%s3773_s4 + $0x28] sm:$0xff] %v1854_v2 }
 0x409   : > { %v1820_v61 = vpop.trf.xlu1 }
 0x40a   : > { %1868 = vst [vmem:[%s3773_s4] sm:$0xff] %v1820_v61 }
 0x40d   : > { %v1855_v58 = vpop.trf.xlu2 }
 0x40e   : > { %1875 = vst [vmem:[%s3773_s4 + $0x38] sm:$0xff] %v1855_v58 }
 0x411   : > { %v1821_v15 = vpop.trf.xlu1 }
 0x412   : > { %1870 = vst [vmem:[%s3773_s4 + $0x10] sm:$0xff] %v1821_v15 }
 0x415   : > { %v1856_v49 = vpop.trf.xlu2 }
 0x416   : > { %1877 = vst [vmem:[%s3773_s4 + $0x48] sm:$0xff] %v1856_v49 }
 0x419   : > { %v1822_v16 = vpop.trf.xlu1 }
 0x41a   : > { %1872 = vst [vmem:[%s3773_s4 + $0x20] sm:$0xff] %v1822_v16 }
 0x41d   : > { %v1857_v39 = vpop.trf.xlu2 }
 0x41e   : > { %1879 = vst [vmem:[%s3773_s4 + $0x58] sm:$0xff] %v1857_v39 }
 0x421   : > { %v1823_v63 = vpop.trf.xlu1 }
 0x422   : > { %1874 = vst [vmem:[%s3773_s4 + $0x30] sm:$0xff] %v1823_v63 }
 0x425   : > { %v1858_v50 = vpop.trf.xlu2 }
 0x426   : > { %1881 = vst [vmem:[%s3773_s4 + $0x68] sm:$0xff] %v1858_v50 }
 0x429   : > { %v1824_v51 = vpop.trf.xlu1 }
 0x42a   : > { %1876 = vst [vmem:[%s3773_s4 + $0x40] sm:$0xff] %v1824_v51 }
 0x42d   : > { %v1859_v26 = vpop.trf.xlu2 }
 0x42e   : > { %1883 = vst [vmem:[%s3773_s4 + $0x78] sm:$0xff] %v1859_v26 }
 0x431   : > { %v1825_v27 = vpop.trf.xlu1 }
 0x432   : > { %1878 = vst [vmem:[%s3773_s4 + $0x50] sm:$0xff] %v1825_v27 }
 0x435   : > { %v1860_v21 = vpop.trf.xlu2 }
 0x436   : > { %1885 = vst [vmem:[%s3773_s4 + $0x88] sm:$0xff] %v1860_v21 }
 0x439   : > { %v1826_v19 = vpop.trf.xlu1 }
 0x43a   : > { %1880 = vst [vmem:[%s3773_s4 + $0x60] sm:$0xff] %v1826_v19 }
 0x43d   : > { %v1861_v24 = vpop.trf.xlu2 }
 0x43e   : > { %1887 = vst [vmem:[%s3773_s4 + $0x98] sm:$0xff] %v1861_v24 }
 0x441   : > { %v1827_v45 = vpop.trf.xlu1 }
 0x442   : > { %1882 = vst [vmem:[%s3773_s4 + $0x70] sm:$0xff] %v1827_v45 }
 0x445   : > { %v1862_v3 = vpop.trf.xlu2 }
 0x446   : > { %1889 = vst [vmem:[%s3773_s4 + $0xa8] sm:$0xff] %v1862_v3 }
 0x449   : > { %v1828_v34 = vpop.trf.xlu1 }
 0x44a   : > { %1884 = vst [vmem:[%s3773_s4 + $0x80] sm:$0xff] %v1828_v34 }
 0x44d   : > { %v1863_v17 = vpop.trf.xlu2 }
 0x44e   : > { %1891 = vst [vmem:[%s3773_s4 + $0xb8] sm:$0xff] %v1863_v17 }
 0x451   : > { %v1829_v29 = vpop.trf.xlu1 }
 0x452   : > { %1886 = vst [vmem:[%s3773_s4 + $0x90] sm:$0xff] %v1829_v29 }
 0x455   : > { %v1864_v38 = vpop.trf.xlu2 }
 0x456   : > { %1893 = vst [vmem:[%s3773_s4 + $0xc8] sm:$0xff] %v1864_v38 }
 0x459   : > { %v1830_v44 = vpop.trf.xlu1 }
 0x45a   : > { %1888 = vst [vmem:[%s3773_s4 + $0xa0] sm:$0xff] %v1830_v44 }
 0x45d   : > { %v1865_v31 = vpop.trf.xlu2 }
 0x45e   : > { %1895 = vst [vmem:[%s3773_s4 + $0xd8] sm:$0xff] %v1865_v31 }
 0x461   : > { %v1831_v48 = vpop.trf.xlu1 }
 0x462   : > { %1890 = vst [vmem:[%s3773_s4 + $0xb0] sm:$0xff] %v1831_v48 }
 0x465   : > { %v1866_v25 = vpop.trf.xlu2 }
 0x466   : > { %1897 = vst [vmem:[%s3773_s4 + $0xe8] sm:$0xff] %v1866_v25 }
 0x469   : > { %v1832_v5 = vpop.trf.xlu1 }
 0x46a   : > { %1892 = vst [vmem:[%s3773_s4 + $0xc0] sm:$0xff] %v1832_v5 }
 0x46d   : > { %v1867_v14 = vpop.trf.xlu2 }
 0x46e   : > { %1899 = vst [vmem:[%s3773_s4 + $0xf8] sm:$0xff] %v1867_v14 }
 0x471   : > { %v1833_v1 = vpop.trf.xlu1 }
 0x472   : > { %1894 = vst [vmem:[%s3773_s4 + $0xd0] sm:$0xff] %v1833_v1 }
 0x479   : > { %v1834_v8 = vpop.trf.xlu1 }
 0x47a   : > { %1896 = vst [vmem:[%s3773_s4 + $0xe0] sm:$0xff] %v1834_v8 }
 0x481   : > { %v1835_v33 = vpop.trf.xlu1 }
 0x482   : > { %1898 = vst [vmem:[%s3773_s4 + $0xf0] sm:$0xff] %v1835_v33 }
 0x483   : > { %2176 = shalt.err (!%p2173_p5)
}
 0x484   : > { %s2238_s28 = smov 256  }
 0x485   : > { %2083 = dma.vmem_to_hbm [thread:$0]  (%p2299_p4), %s1917_s18, 4096, %s1919_s9, %s1901_s19, %s2238_s28, %s2238_s28, %s2230_s5  }
 0x486 PF: > { %p2089_p6 = scmp.ge.s32.totalorder %s2227_s17, 2  ;;  %s1933_s29 = sand.u32 1, %s2207_s12  }
 0x487   : > { %s1934_s4 = scalar_lea.sflag [#allocation4], %s1933_s29 }
 0x488   : > { %p2086_p7 = pnand %p2089_p6, %p2306_p8 }
 0x48a   : > { %p2087_p9 = pneg %p2086_p7 }
 0x48c   : > { %2202 = dma.done.wait (%p2087_p9), %s1934_s4, 4096  }
 0x48d   : > { %2204 = vsyncadd (%p2087_p9), %s1934_s4, 4294963200  ;;  %s16_s17 = sadd.s32 1, %s2227_s17   ;;  %s4048_s12 = smov %s2211_s13 }
 0x48e   : > { %p13_p10 = scmp.ge.s32.totalorder %s16_s17, 4   ;;  %s4049_s13 = smov %s2215_s14 }
 0x48f   : > { %s4050_s14 = smov %s2312_s25  ;;  %s4051_s15 = smov %s2223_s16 }
 0x490   : > { %s4052_s16 = smov %s4054_s20  ;;  %15 = sbr.rel (!%p13_p10) target bundleno = 4 (0x4), region = 77 }
 0x495   :  { %1940 = vsyncpa [#allocation4], 1 }
 0x496   :  { %1942 = vsyncpa [#allocation4 + $0x1], 1 }

</bundles_post_ra>
